<compile_context>
chip_gen: v7x
topology: tpu7x:2x2x1
jax: 0.10.0
libtpu: 0.0.40
codegen_flags: <defaults>
</compile_context>

<pallas_src>
import functools
import math

import jax
import jax.numpy as jnp
from jax.experimental import pallas as pl
from jax.experimental.pallas import tpu as pltpu

BN_EPS = 1e-5
# Safe on every generation (v7x physical VMEM is 64 MiB).  On v5e/v6e this can
# be raised toward ~96 MiB to buy larger tiles / deeper buffering.
VMEM_LIMIT = 48 * 1024 * 1024


def qkv_proj_kernel(x_ref, wq_ref, bq_ref, wk_ref, bk_ref, wv_ref, bv_ref,
                    q_ref, k_ref, v_ref, *, inv_sqrt_dim: float):
  """Per-head Q/K/V projection for one (batch, token-tile, head) grid cell.

  Head is the innermost grid axis, so the x tile block index is unchanged
  across heads and is not re-DMA'd; only the small per-head weight slices move.
  """
  x = x_ref[0, :, :].astype(jnp.bfloat16)                       # (TN, D)
  q = (jnp.dot(x, wq_ref[0, :, :], preferred_element_type=jnp.float32)
       + bq_ref[0, :, :]) * inv_sqrt_dim       # fold 1/sqrt(hd) into Q (incl. bias)
  k = jnp.dot(x, wk_ref[0, :, :], preferred_element_type=jnp.float32) + bk_ref[0, :, :]
  v = jnp.dot(x, wv_ref[0, :, :], preferred_element_type=jnp.float32) + bv_ref[0, :, :]
  q_ref[0, 0, :, :] = q.astype(q_ref.dtype)                     # (TN, hd) bf16
  k_ref[0, 0, :, :] = k.astype(k_ref.dtype)
  v_ref[0, 0, :, :] = v.astype(v_ref.dtype)


def attn_h1_kernel(xq_ref, q_ref, k_ref, v_ref,
                   wm_ref, bm_ref, w1x_ref, w1m_ref, b1_ref,
                   h1_ref, stats_ref, *, num_heads: int):
  """Attention + merge + first MLP conv for one (batch, query-tile) grid cell."""
  qh = q_ref[0, :, :, :]                       # (H, TQ, hd) bf16, pre-scaled
  kh = k_ref[0, :, :, :]                       # (H, N,  hd) bf16 (precomputed once)
  vh = v_ref[0, :, :, :]                       # (H, N,  hd) bf16

  # Scores + softmax in f32 (max-subtract for stability, exact reciprocal).
  s = jnp.einsum('hqd,hkd->hqk', qh, kh,
                 preferred_element_type=jnp.float32)            # (H, TQ, N)
  s = s - jnp.max(s, axis=-1, keepdims=True)
  p = jnp.exp(s)
  p = p * pl.reciprocal(jnp.sum(p, axis=-1, keepdims=True), approx=False)
  o = jnp.einsum('hqk,hkd->hqd', p.astype(jnp.bfloat16), vh,
                 preferred_element_type=jnp.float32)            # (H, TQ, hd) f32

  # Re-assemble heads on contiguous lanes, then ONE full-depth (K = D) merge
  # matmul.  Lane-slice concat (H slices) is kept over transpose+reshape for
  # lowering safety; it happens once per tile and rides the XLU slot.
  o2 = jnp.concatenate([o[h] for h in range(num_heads)],
                       axis=-1).astype(jnp.bfloat16)            # (TQ, D)
  message = (jnp.dot(o2, wm_ref[...], preferred_element_type=jnp.float32)
             + bm_ref[...])                                     # (TQ, D) f32

  # First MLP conv: torch.cat([x, message], dim=1) folded by splitting W1.
  xq = xq_ref[0, :, :].astype(jnp.bfloat16)                     # (TQ, D)
  h1 = (jnp.dot(xq, w1x_ref[...], preferred_element_type=jnp.float32)
        + jnp.dot(message.astype(jnp.bfloat16), w1m_ref[...],
                  preferred_element_type=jnp.float32)
        + b1_ref[...])                                          # (TQ, 2D) f32
  h1_ref[0, :, :] = h1.astype(h1_ref.dtype)                     # bf16 writeback

  # One-pass BatchNorm partials (f32), lane-dense: one (1, 4D) row per tile.
  ssum = jnp.sum(h1, axis=0, keepdims=True)                     # (1, 2D)
  ssq = jnp.sum(h1 * h1, axis=0, keepdims=True)                 # (1, 2D)
  stats_ref[0, 0, :, :] = jnp.concatenate([ssum, ssq], axis=-1)


def bn_relu_proj_kernel(h1_ref, scale_ref, shift_ref, w2_ref, b2_ref, out_ref):
  """Folded BatchNorm affine + ReLU + last MLP conv for one (b, tile) cell."""
  h1 = h1_ref[0, :, :].astype(jnp.float32)                      # (TB, 2D)
  a = jnp.maximum(h1 * scale_ref[...] + shift_ref[...], 0.0)
  y = (jnp.dot(a.astype(jnp.bfloat16), w2_ref[...],
               preferred_element_type=jnp.float32) + b2_ref[...])
  out_ref[0, :, :] = y.astype(out_ref.dtype)


def init_params(key, feature_dim):
  """Deterministic synthetic parameters with the shapes implied by __init__."""
  D = feature_dim
  ks = jax.random.split(key, 11)

  def w(k, o, i):
    return jax.random.normal(k, (o, i), jnp.float32) / math.sqrt(i)

  def b(k, o):
    return jax.random.normal(k, (o,), jnp.float32) * 0.01

  return dict(
      wq=w(ks[0], D, D), bq=b(ks[1], D),
      wk=w(ks[2], D, D), bk=b(ks[3], D),
      wv=w(ks[4], D, D), bv=b(ks[5], D),
      wm=w(ks[6], D, D), bm=b(ks[7], D),
      w1=w(ks[8], 2 * D, 2 * D), b1=b(ks[9], 2 * D),
      gamma=jnp.ones((2 * D,), jnp.float32),   # BatchNorm1d default weight
      beta=jnp.zeros((2 * D,), jnp.float32),   # BatchNorm1d default bias
      w2=w(ks[10], D, 2 * D),
      b2=jnp.zeros((D,), jnp.float32),         # nn.init.constant_(mlp[-1].bias, 0)
  )


def attentional_propagation(x_bdn, params, num_heads, *,
                            q_tile=None, tok_tile=None, out_tile=None):
  """x_bdn: (B, D, N) float32, like the PyTorch module. Returns (B, D, N)."""
  B, D, N = x_bdn.shape
  assert D % num_heads == 0
  head_dim = D // num_heads
  two_d = 2 * D
  inv_sqrt_dim = 1.0 / math.sqrt(head_dim)
  bf16 = jnp.bfloat16
  row = lambda v: v.reshape(1, -1).astype(jnp.float32)

  # Tile sizes (clamped to N at demo scale).  Review guidance: q_tile 128
  # (v5e) / 256 (v6e, v7x if VMEM allows); kernel B has no N^2 term, so it
  # gets a bigger HBM-roofline tile.
  def pick(t, target):
    t = min(target if t is None else t, N)
    assert N % t == 0 and t % 8 == 0, (N, t)
    return t
  q_tile = pick(q_tile, 128)
  tok_tile = pick(tok_tile, 256)
  out_tile = pick(out_tile, 512)
  n_qt, n_tt, n_ot = N // q_tile, N // tok_tile, N // out_tile

  # Channel permutation making each head's channels a contiguous lane block:
  #   new index h*head_dim + d  <-  original channel index d*num_heads + h
  perm = jnp.arange(D).reshape(head_dim, num_heads).T.reshape(-1)

  def per_head(w, b):
    """(D,D)/(D,) torch conv params -> (H, D, hd) bf16 weight, (H,1,hd) f32 bias."""
    wt = w[perm, :].T                                   # (D_in, D_out head-major)
    wt = wt.reshape(D, num_heads, head_dim).transpose(1, 0, 2).astype(bf16)
    bh = b[perm].reshape(num_heads, 1, head_dim).astype(jnp.float32)
    return wt, bh

  wq, bq = per_head(params['wq'], params['bq'])
  wk, bk = per_head(params['wk'], params['bk'])
  wv, bv = per_head(params['wv'], params['bv'])
  wm = params['wm'][:, perm].T.astype(bf16)             # (D head-major, D)
  w1T = params['w1'].T                                  # (2D, 2D)
  w1x = w1T[:D, :].astype(bf16)                         # acts on x
  w1m = w1T[D:, :].astype(bf16)                         # acts on message
  w2 = params['w2'].T.astype(bf16)                      # (2D, D)

  # NCW -> NWC once (tokens on sublanes, channels on lanes).
  # TODO(synk): at production scale fuse this transpose (and the output one)
  # into the kernels ((1, D, TQ) blocks + in-kernel XLU transpose) to avoid
  # the extra HBM round-trip of x / y.
  x = jnp.transpose(x_bdn, (0, 2, 1)).astype(jnp.float32)       # (B, N, D)

  # Constant weights / biases: block index never changes -> never re-DMA'd.
  # (On v7x, pipeline_mode=pl.Buffered(1) would additionally halve their VMEM.)
  const = lambda a: pl.BlockSpec(a.shape, lambda *_: (0,) * a.ndim)

  # ---- kernel 0: Q/K/V projections, once per token, head-major bf16 output ----
  hd = head_dim
  q_hm, k_hm, v_hm = pl.pallas_call(
      functools.partial(qkv_proj_kernel, inv_sqrt_dim=inv_sqrt_dim),
      grid=(B, n_tt, num_heads),
      in_specs=[
          pl.BlockSpec((1, tok_tile, D), lambda b, t, h: (b, t, 0)),
          pl.BlockSpec((1, D, hd), lambda b, t, h: (h, 0, 0)),
          pl.BlockSpec((1, 1, hd), lambda b, t, h: (h, 0, 0)),
          pl.BlockSpec((1, D, hd), lambda b, t, h: (h, 0, 0)),
          pl.BlockSpec((1, 1, hd), lambda b, t, h: (h, 0, 0)),
          pl.BlockSpec((1, D, hd), lambda b, t, h: (h, 0, 0)),
          pl.BlockSpec((1, 1, hd), lambda b, t, h: (h, 0, 0)),
      ],
      out_specs=[pl.BlockSpec((1, 1, tok_tile, hd),
                              lambda b, t, h: (b, h, t, 0))] * 3,
      out_shape=[jax.ShapeDtypeStruct((B, num_heads, N, hd), bf16)] * 3,
      compiler_params=pltpu.CompilerParams(
          dimension_semantics=("parallel", "parallel", "parallel"),
          vmem_limit_bytes=VMEM_LIMIT),
  )(x, wq, bq, wk, bk, wv, bv)

  # ---- kernel A: attention + merge + first MLP conv, + BN partial sums ----
  a_args = (x, q_hm, k_hm, v_hm, wm, row(params['bm']), w1x, w1m, row(params['b1']))
  in_specs_a = [
      pl.BlockSpec((1, q_tile, D), lambda b, q: (b, q, 0)),             # x tile
      pl.BlockSpec((1, num_heads, q_tile, hd), lambda b, q: (b, 0, q, 0)),
      pl.BlockSpec((1, num_heads, N, hd), lambda b, q: (b, 0, 0, 0)),   # full K
      pl.BlockSpec((1, num_heads, N, hd), lambda b, q: (b, 0, 0, 0)),   # full V
  ] + [const(a) for a in a_args[4:]]
  # NOTE: for very large N on v7x (64 MiB VMEM) add a KV grid axis marked
  # "arbitrary" with an online (flash-style) softmax so the (H,TQ,N) scores
  # shrink to (H,TQ,TKV); unnecessary at SuperGlue sizes.

  h1, stats = pl.pallas_call(
      functools.partial(attn_h1_kernel, num_heads=num_heads),
      grid=(B, n_qt),
      in_specs=in_specs_a,
      out_specs=(pl.BlockSpec((1, q_tile, two_d), lambda b, q: (b, q, 0)),
                 pl.BlockSpec((1, 1, 1, 2 * two_d), lambda b, q: (b, q, 0, 0))),
      out_shape=(jax.ShapeDtypeStruct((B, N, two_d), bf16),
                 jax.ShapeDtypeStruct((B, n_qt, 1, 2 * two_d), jnp.float32)),
      compiler_params=pltpu.CompilerParams(
          dimension_semantics=("parallel", "parallel"),
          vmem_limit_bytes=VMEM_LIMIT),
  )(*a_args)

  # ---- global BatchNorm statistics (tiny cross-tile reduction in XLA) ----
  count = B * N
  sums = jnp.sum(stats, axis=(0, 1, 2))                 # (4D,) f32
  mean = sums[:two_d] / count
  var = jnp.maximum(sums[two_d:] / count - mean * mean, 0.0)
  rstd = jax.lax.rsqrt(var + BN_EPS)
  scale = row(params['gamma'] * rstd)
  shift = row(params['beta'] - mean * params['gamma'] * rstd)

  # ---- kernel B: BN affine + ReLU + last MLP conv (HBM-bound, big tile) ----
  b_args = (h1, scale, shift, w2, row(params['b2']))
  in_specs_b = [pl.BlockSpec((1, out_tile, two_d), lambda b, q: (b, q, 0))
                ] + [const(a) for a in b_args[1:]]
  y = pl.pallas_call(
      bn_relu_proj_kernel,
      grid=(B, n_ot),
      in_specs=in_specs_b,
      out_specs=pl.BlockSpec((1, out_tile, D), lambda b, q: (b, q, 0)),
      out_shape=jax.ShapeDtypeStruct((B, N, D), jnp.float32),
      compiler_params=pltpu.CompilerParams(
          dimension_semantics=("parallel", "parallel"),
          vmem_limit_bytes=VMEM_LIMIT),
  )(*b_args)
  return jnp.transpose(y, (0, 2, 1))                    # back to (B, D, N)


def reference(x, params, num_heads):
  """Pure-JAX f32 transcription of the PyTorch forward (NCW layout)."""
  B, D, N = x.shape
  head_dim = D // num_heads

  def conv1d(z, w, b):  # w: (O, I), kernel_size=1
    return jnp.einsum('oi,bin->bon', w, z) + b[None, :, None]

  q = conv1d(x, params['wq'], params['bq']).reshape(B, head_dim, num_heads, N)
  k = conv1d(x, params['wk'], params['bk']).reshape(B, head_dim, num_heads, N)
  v = conv1d(x, params['wv'], params['bv']).reshape(B, head_dim, num_heads, N)
  scores = jnp.einsum('bdhn,bdhm->bhnm', q, k) / math.sqrt(head_dim)
  prob = jax.nn.softmax(scores, axis=-1)
  o = jnp.einsum('bhnm,bdhm->bdhn', prob, v).reshape(B, D, N)
  message = conv1d(o, params['wm'], params['bm'])
  cat = jnp.concatenate([x, message], axis=1)
  h1 = conv1d(cat, params['w1'], params['b1'])
  mean = jnp.mean(h1, axis=(0, 2), keepdims=True)
  var = jnp.mean((h1 - mean) ** 2, axis=(0, 2), keepdims=True)
  h1 = (h1 - mean) / jnp.sqrt(var + BN_EPS)
  h1 = h1 * params['gamma'][None, :, None] + params['beta'][None, :, None]
  h1 = jnp.maximum(h1, 0.0)
  return conv1d(h1, params['w2'], params['b2'])


if __name__ == "__main__":
  B, D, N, H = 2, 128, 32, 4    # batch, feature_dim, num_keypoints, num_heads
  key = jax.random.PRNGKey(0)
  kx, kp = jax.random.split(key)
  x = jax.random.normal(kx, (B, D, N), jnp.float32)
  params = init_params(kp, D)

  fwd = jax.jit(functools.partial(attentional_propagation, num_heads=H))
  y = jax.block_until_ready(fwd(x, params))

  y_ref = reference(x, params, H)
  assert y.shape == (B, D, N), y.shape
  max_err = float(jnp.max(jnp.abs(y - y_ref)))
  # bf16 MXU operands / bf16 Q,K,V,h1 intermediates (f32 accumulation & f32
  # softmax/BN statistics) vs a pure-f32 reference -> relaxed tolerance.
  assert max_err < 0.15, f"mismatch vs reference, max_err={max_err}"
  print("KERNEL_OK")
</pallas_src>

<mosaic_0001>
module attributes {stable_mosaic.version = 11 : i64} {
  func.func @qkv_proj_kernel(%arg0: i32, %arg1: i32, %arg2: i32, %arg3: memref<1x32x128xf32, #tpu.memory_space<vmem>>, %arg4: memref<1x128x32xbf16, #tpu.memory_space<vmem>>, %arg5: memref<1x1x32xf32, #tpu.memory_space<vmem>>, %arg6: memref<1x128x32xbf16, #tpu.memory_space<vmem>>, %arg7: memref<1x1x32xf32, #tpu.memory_space<vmem>>, %arg8: memref<1x128x32xbf16, #tpu.memory_space<vmem>>, %arg9: memref<1x1x32xf32, #tpu.memory_space<vmem>>, %arg10: memref<1x1x32x32xbf16, #tpu.memory_space<vmem>>, %arg11: memref<1x1x32x32xbf16, #tpu.memory_space<vmem>>, %arg12: memref<1x1x32x32xbf16, #tpu.memory_space<vmem>>) attributes {dimension_semantics = [#tpu.dimension_semantics<parallel>, #tpu.dimension_semantics<parallel>, #tpu.dimension_semantics<parallel>], iteration_bounds = array<i64: 2, 1, 4>, scalar_prefetch = 0 : i64, scratch_operands = 0 : i64, tpu.core_type = #tpu.core_type<tc>, window_params = [{transform_indices = @transform_0, window_bounds = array<i64: 1, 32, 128>}, {transform_indices = @transform_1, window_bounds = array<i64: 1, 128, 32>}, {transform_indices = @transform_2, window_bounds = array<i64: 1, 1, 32>}, {transform_indices = @transform_3, window_bounds = array<i64: 1, 128, 32>}, {transform_indices = @transform_4, window_bounds = array<i64: 1, 1, 32>}, {transform_indices = @transform_5, window_bounds = array<i64: 1, 128, 32>}, {transform_indices = @transform_6, window_bounds = array<i64: 1, 1, 32>}, {transform_indices = @transform_7, window_bounds = array<i64: 1, 1, 32, 32>}, {transform_indices = @transform_8, window_bounds = array<i64: 1, 1, 32, 32>}, {transform_indices = @transform_9, window_bounds = array<i64: 1, 1, 32, 32>}]} {
    %c0 = arith.constant 0 : index
    %c0_0 = arith.constant 0 : index
    %c0_1 = arith.constant 0 : index
    %0 = vector.load %arg3[%c0, %c0_0, %c0_1] : memref<1x32x128xf32, #tpu.memory_space<vmem>>, vector<1x32x128xf32>
    %1 = vector.shape_cast %0 : vector<1x32x128xf32> to vector<32x128xf32>
    %2 = arith.truncf %1 : vector<32x128xf32> to vector<32x128xbf16>
    %c0_2 = arith.constant 0 : index
    %c0_3 = arith.constant 0 : index
    %c0_4 = arith.constant 0 : index
    %3 = vector.load %arg4[%c0_2, %c0_3, %c0_4] : memref<1x128x32xbf16, #tpu.memory_space<vmem>>, vector<1x128x32xbf16>
    %4 = vector.shape_cast %3 : vector<1x128x32xbf16> to vector<128x32xbf16>
    %cst = arith.constant dense<0.000000e+00> : vector<32x32xf32>
    %5 = tpu.matmul %2, %4, %cst {dimension_numbers = #tpu.dot_dimension_numbers<[1], [0], [0], [1], [0, 0, 1, 1], [], []>} : vector<32x128xbf16>, vector<128x32xbf16>, vector<32x32xf32> -> vector<32x32xf32>
    %c0_5 = arith.constant 0 : index
    %c0_6 = arith.constant 0 : index
    %c0_7 = arith.constant 0 : index
    %6 = vector.load %arg5[%c0_5, %c0_6, %c0_7] : memref<1x1x32xf32, #tpu.memory_space<vmem>>, vector<1x1x32xf32>
    %7 = vector.shape_cast %6 : vector<1x1x32xf32> to vector<1x32xf32>
    %8 = vector.broadcast %7 : vector<1x32xf32> to vector<32x32xf32>
    %9 = arith.addf %5, %8 : vector<32x32xf32>
    %cst_8 = arith.constant 0.176776692 : f32
    %10 = vector.broadcast %cst_8 : f32 to vector<32x32xf32>
    %11 = arith.mulf %9, %10 : vector<32x32xf32>
    %c0_9 = arith.constant 0 : index
    %c0_10 = arith.constant 0 : index
    %c0_11 = arith.constant 0 : index
    %12 = vector.load %arg6[%c0_9, %c0_10, %c0_11] : memref<1x128x32xbf16, #tpu.memory_space<vmem>>, vector<1x128x32xbf16>
    %13 = vector.shape_cast %12 : vector<1x128x32xbf16> to vector<128x32xbf16>
    %cst_12 = arith.constant dense<0.000000e+00> : vector<32x32xf32>
    %14 = tpu.matmul %2, %13, %cst_12 {dimension_numbers = #tpu.dot_dimension_numbers<[1], [0], [0], [1], [0, 0, 1, 1], [], []>} : vector<32x128xbf16>, vector<128x32xbf16>, vector<32x32xf32> -> vector<32x32xf32>
    %c0_13 = arith.constant 0 : index
    %c0_14 = arith.constant 0 : index
    %c0_15 = arith.constant 0 : index
    %15 = vector.load %arg7[%c0_13, %c0_14, %c0_15] : memref<1x1x32xf32, #tpu.memory_space<vmem>>, vector<1x1x32xf32>
    %16 = vector.shape_cast %15 : vector<1x1x32xf32> to vector<1x32xf32>
    %17 = vector.broadcast %16 : vector<1x32xf32> to vector<32x32xf32>
    %18 = arith.addf %14, %17 : vector<32x32xf32>
    %c0_16 = arith.constant 0 : index
    %c0_17 = arith.constant 0 : index
    %c0_18 = arith.constant 0 : index
    %19 = vector.load %arg8[%c0_16, %c0_17, %c0_18] : memref<1x128x32xbf16, #tpu.memory_space<vmem>>, vector<1x128x32xbf16>
    %20 = vector.shape_cast %19 : vector<1x128x32xbf16> to vector<128x32xbf16>
    %cst_19 = arith.constant dense<0.000000e+00> : vector<32x32xf32>
    %21 = tpu.matmul %2, %20, %cst_19 {dimension_numbers = #tpu.dot_dimension_numbers<[1], [0], [0], [1], [0, 0, 1, 1], [], []>} : vector<32x128xbf16>, vector<128x32xbf16>, vector<32x32xf32> -> vector<32x32xf32>
    %c0_20 = arith.constant 0 : index
    %c0_21 = arith.constant 0 : index
    %c0_22 = arith.constant 0 : index
    %22 = vector.load %arg9[%c0_20, %c0_21, %c0_22] : memref<1x1x32xf32, #tpu.memory_space<vmem>>, vector<1x1x32xf32>
    %23 = vector.shape_cast %22 : vector<1x1x32xf32> to vector<1x32xf32>
    %24 = vector.broadcast %23 : vector<1x32xf32> to vector<32x32xf32>
    %25 = arith.addf %21, %24 : vector<32x32xf32>
    %26 = arith.truncf %11 : vector<32x32xf32> to vector<32x32xbf16>
    %c0_23 = arith.constant 0 : index
    %c0_24 = arith.constant 0 : index
    %c0_25 = arith.constant 0 : index
    %c0_26 = arith.constant 0 : index
    %27 = vector.load %arg10[%c0_23, %c0_24, %c0_25, %c0_26] : memref<1x1x32x32xbf16, #tpu.memory_space<vmem>>, vector<1x1x32x32xbf16>
    %28 = vector.shape_cast %27 : vector<1x1x32x32xbf16> to vector<32x32xbf16>
    %29 = vector.shape_cast %26 : vector<32x32xbf16> to vector<1x1x32x32xbf16>
    tpu.vector_store %arg10[%c0_23, %c0_24, %c0_25, %c0_26], %29 {strides = array<i32>} : memref<1x1x32x32xbf16, #tpu.memory_space<vmem>>, vector<1x1x32x32xbf16>,
    %30 = arith.truncf %18 : vector<32x32xf32> to vector<32x32xbf16>
    %c0_27 = arith.constant 0 : index
    %c0_28 = arith.constant 0 : index
    %c0_29 = arith.constant 0 : index
    %c0_30 = arith.constant 0 : index
    %31 = vector.load %arg11[%c0_27, %c0_28, %c0_29, %c0_30] : memref<1x1x32x32xbf16, #tpu.memory_space<vmem>>, vector<1x1x32x32xbf16>
    %32 = vector.shape_cast %31 : vector<1x1x32x32xbf16> to vector<32x32xbf16>
    %33 = vector.shape_cast %30 : vector<32x32xbf16> to vector<1x1x32x32xbf16>
    tpu.vector_store %arg11[%c0_27, %c0_28, %c0_29, %c0_30], %33 {strides = array<i32>} : memref<1x1x32x32xbf16, #tpu.memory_space<vmem>>, vector<1x1x32x32xbf16>,
    %34 = arith.truncf %25 : vector<32x32xf32> to vector<32x32xbf16>
    %c0_31 = arith.constant 0 : index
    %c0_32 = arith.constant 0 : index
    %c0_33 = arith.constant 0 : index
    %c0_34 = arith.constant 0 : index
    %35 = vector.load %arg12[%c0_31, %c0_32, %c0_33, %c0_34] : memref<1x1x32x32xbf16, #tpu.memory_space<vmem>>, vector<1x1x32x32xbf16>
    %36 = vector.shape_cast %35 : vector<1x1x32x32xbf16> to vector<32x32xbf16>
    %37 = vector.shape_cast %34 : vector<32x32xbf16> to vector<1x1x32x32xbf16>
    tpu.vector_store %arg12[%c0_31, %c0_32, %c0_33, %c0_34], %37 {strides = array<i32>} : memref<1x1x32x32xbf16, #tpu.memory_space<vmem>>, vector<1x1x32x32xbf16>,
    return
  }
  func.func @transform_0(%arg0: i32, %arg1: i32, %arg2: i32) -> (i32, i32, i32) {
    %c0_i32 = arith.constant 0 : i32
    %c0_i32_0 = arith.constant 0 : i32
    return %arg0, %arg1, %c0_i32 : i32, i32, i32
  }
  func.func @transform_1(%arg0: i32, %arg1: i32, %arg2: i32) -> (i32, i32, i32) {
    %c0_i32 = arith.constant 0 : i32
    %c0_i32_0 = arith.constant 0 : i32
    %c0_i32_1 = arith.constant 0 : i32
    return %arg2, %c0_i32, %c0_i32_0 : i32, i32, i32
  }
  func.func @transform_2(%arg0: i32, %arg1: i32, %arg2: i32) -> (i32, i32, i32) {
    %c0_i32 = arith.constant 0 : i32
    %c0_i32_0 = arith.constant 0 : i32
    %c0_i32_1 = arith.constant 0 : i32
    return %arg2, %c0_i32, %c0_i32_0 : i32, i32, i32
  }
  func.func @transform_3(%arg0: i32, %arg1: i32, %arg2: i32) -> (i32, i32, i32) {
    %c0_i32 = arith.constant 0 : i32
    %c0_i32_0 = arith.constant 0 : i32
    %c0_i32_1 = arith.constant 0 : i32
    return %arg2, %c0_i32, %c0_i32_0 : i32, i32, i32
  }
  func.func @transform_4(%arg0: i32, %arg1: i32, %arg2: i32) -> (i32, i32, i32) {
    %c0_i32 = arith.constant 0 : i32
    %c0_i32_0 = arith.constant 0 : i32
    %c0_i32_1 = arith.constant 0 : i32
    return %arg2, %c0_i32, %c0_i32_0 : i32, i32, i32
  }
  func.func @transform_5(%arg0: i32, %arg1: i32, %arg2: i32) -> (i32, i32, i32) {
    %c0_i32 = arith.constant 0 : i32
    %c0_i32_0 = arith.constant 0 : i32
    %c0_i32_1 = arith.constant 0 : i32
    return %arg2, %c0_i32, %c0_i32_0 : i32, i32, i32
  }
  func.func @transform_6(%arg0: i32, %arg1: i32, %arg2: i32) -> (i32, i32, i32) {
    %c0_i32 = arith.constant 0 : i32
    %c0_i32_0 = arith.constant 0 : i32
    %c0_i32_1 = arith.constant 0 : i32
    return %arg2, %c0_i32, %c0_i32_0 : i32, i32, i32
  }
  func.func @transform_7(%arg0: i32, %arg1: i32, %arg2: i32) -> (i32, i32, i32, i32) {
    %c0_i32 = arith.constant 0 : i32
    %c0_i32_0 = arith.constant 0 : i32
    return %arg0, %arg2, %arg1, %c0_i32 : i32, i32, i32, i32
  }
  func.func @transform_8(%arg0: i32, %arg1: i32, %arg2: i32) -> (i32, i32, i32, i32) {
    %c0_i32 = arith.constant 0 : i32
    %c0_i32_0 = arith.constant 0 : i32
    return %arg0, %arg2, %arg1, %c0_i32 : i32, i32, i32, i32
  }
  func.func @transform_9(%arg0: i32, %arg1: i32, %arg2: i32) -> (i32, i32, i32, i32) {
    %c0_i32 = arith.constant 0 : i32
    %c0_i32_0 = arith.constant 0 : i32
    return %arg0, %arg2, %arg1, %c0_i32 : i32, i32, i32, i32
  }
}

module attributes {stable_mosaic.version = 11 : i64} {
  func.func @attn_h1_kernel(%arg0: i32, %arg1: i32, %arg2: memref<1x32x128xf32, #tpu.memory_space<vmem>>, %arg3: memref<1x4x32x32xbf16, #tpu.memory_space<vmem>>, %arg4: memref<1x4x32x32xbf16, #tpu.memory_space<vmem>>, %arg5: memref<1x4x32x32xbf16, #tpu.memory_space<vmem>>, %arg6: memref<128x128xbf16, #tpu.memory_space<vmem>>, %arg7: memref<1x128xf32, #tpu.memory_space<vmem>>, %arg8: memref<128x256xbf16, #tpu.memory_space<vmem>>, %arg9: memref<128x256xbf16, #tpu.memory_space<vmem>>, %arg10: memref<1x256xf32, #tpu.memory_space<vmem>>, %arg11: memref<1x32x256xbf16, #tpu.memory_space<vmem>>, %arg12: memref<1x1x1x512xf32, #tpu.memory_space<vmem>>) attributes {dimension_semantics = [#tpu.dimension_semantics<parallel>, #tpu.dimension_semantics<parallel>], iteration_bounds = array<i64: 2, 1>, scalar_prefetch = 0 : i64, scratch_operands = 0 : i64, tpu.core_type = #tpu.core_type<tc>, window_params = [{transform_indices = @transform_0, window_bounds = array<i64: 1, 32, 128>}, {transform_indices = @transform_1, window_bounds = array<i64: 1, 4, 32, 32>}, {transform_indices = @transform_2, window_bounds = array<i64: 1, 4, 32, 32>}, {transform_indices = @transform_3, window_bounds = array<i64: 1, 4, 32, 32>}, {pipeline_mode = #tpu.pipeline_mode<synchronous>, transform_indices = @transform_4, window_bounds = array<i64: 128, 128>}, {pipeline_mode = #tpu.pipeline_mode<synchronous>, transform_indices = @transform_5, window_bounds = array<i64: 1, 128>}, {pipeline_mode = #tpu.pipeline_mode<synchronous>, transform_indices = @transform_6, window_bounds = array<i64: 128, 256>}, {pipeline_mode = #tpu.pipeline_mode<synchronous>, transform_indices = @transform_7, window_bounds = array<i64: 128, 256>}, {pipeline_mode = #tpu.pipeline_mode<synchronous>, transform_indices = @transform_8, window_bounds = array<i64: 1, 256>}, {transform_indices = @transform_9, window_bounds = array<i64: 1, 32, 256>}, {transform_indices = @transform_10, window_bounds = array<i64: 1, 1, 1, 512>}]} {
    %c0 = arith.constant 0 : index
    %c0_0 = arith.constant 0 : index
    %c0_1 = arith.constant 0 : index
    %c0_2 = arith.constant 0 : index
    %0 = vector.load %arg3[%c0, %c0_0, %c0_1, %c0_2] : memref<1x4x32x32xbf16, #tpu.memory_space<vmem>>, vector<1x4x32x32xbf16>
    %1 = vector.shape_cast %0 : vector<1x4x32x32xbf16> to vector<4x32x32xbf16>
    %c0_3 = arith.constant 0 : index
    %c0_4 = arith.constant 0 : index
    %c0_5 = arith.constant 0 : index
    %c0_6 = arith.constant 0 : index
    %2 = vector.load %arg4[%c0_3, %c0_4, %c0_5, %c0_6] : memref<1x4x32x32xbf16, #tpu.memory_space<vmem>>, vector<1x4x32x32xbf16>
    %3 = vector.shape_cast %2 : vector<1x4x32x32xbf16> to vector<4x32x32xbf16>
    %c0_7 = arith.constant 0 : index
    %c0_8 = arith.constant 0 : index
    %c0_9 = arith.constant 0 : index
    %c0_10 = arith.constant 0 : index
    %4 = vector.load %arg5[%c0_7, %c0_8, %c0_9, %c0_10] : memref<1x4x32x32xbf16, #tpu.memory_space<vmem>>, vector<1x4x32x32xbf16>
    %5 = vector.shape_cast %4 : vector<1x4x32x32xbf16> to vector<4x32x32xbf16>
    "tpu.trace_start"() <{level = 10 : i32, message = "hqd,hkd->hqk"}> : () -> ()
    %cst = arith.constant dense<0.000000e+00> : vector<4x32x32xf32>
    %6 = tpu.matmul %1, %3, %cst {dimension_numbers = #tpu.dot_dimension_numbers<[2], [2], [1], [1], [0, 0, 0, 1, 1, 1], [0], [0]>} : vector<4x32x32xbf16>, vector<4x32x32xbf16>, vector<4x32x32xf32> -> vector<4x32x32xf32>
    "tpu.trace_stop"() : () -> ()
    %cst_11 = arith.constant dense<0xFF800000> : vector<4x32xf32>
    %7 = vector.multi_reduction <maximumf>, %6, %cst_11 [2] : vector<4x32x32xf32> to vector<4x32xf32>
    %8 = vector.shape_cast %7 : vector<4x32xf32> to vector<4x32x1xf32>
    %9 = vector.broadcast %8 : vector<4x32x1xf32> to vector<4x32x32xf32>
    %10 = arith.subf %6, %9 : vector<4x32x32xf32>
    %11 = math.exp %10 : vector<4x32x32xf32>
    %cst_12 = arith.constant dense<0.000000e+00> : vector<4x32xf32>
    %12 = vector.multi_reduction <add>, %11, %cst_12 [2] : vector<4x32x32xf32> to vector<4x32xf32>
    %13 = vector.shape_cast %12 : vector<4x32xf32> to vector<4x32x1xf32>
    %14 = tpu.reciprocal %13 : vector<4x32x1xf32> -> vector<4x32x1xf32>
    %15 = vector.broadcast %14 : vector<4x32x1xf32> to vector<4x32x32xf32>
    %16 = arith.mulf %11, %15 : vector<4x32x32xf32>
    %17 = arith.truncf %16 : vector<4x32x32xf32> to vector<4x32x32xbf16>
    "tpu.trace_start"() <{level = 10 : i32, message = "hqk,hkd->hqd"}> : () -> ()
    %cst_13 = arith.constant dense<0.000000e+00> : vector<4x32x32xf32>
    %18 = tpu.matmul %17, %5, %cst_13 {dimension_numbers = #tpu.dot_dimension_numbers<[2], [1], [1], [2], [0, 0, 0, 1, 1, 2], [0], [0]>} : vector<4x32x32xbf16>, vector<4x32x32xbf16>, vector<4x32x32xf32> -> vector<4x32x32xf32>
    "tpu.trace_stop"() : () -> ()
    %19 = vector.extract_strided_slice %18 {offsets = [0, 0, 0], sizes = [1, 32, 32], strides = [1, 1, 1]} : vector<4x32x32xf32> to vector<1x32x32xf32>
    %20 = vector.shape_cast %19 : vector<1x32x32xf32> to vector<32x32xf32>
    %21 = vector.extract_strided_slice %18 {offsets = [1, 0, 0], sizes = [1, 32, 32], strides = [1, 1, 1]} : vector<4x32x32xf32> to vector<1x32x32xf32>
    %22 = vector.shape_cast %21 : vector<1x32x32xf32> to vector<32x32xf32>
    %23 = vector.extract_strided_slice %18 {offsets = [2, 0, 0], sizes = [1, 32, 32], strides = [1, 1, 1]} : vector<4x32x32xf32> to vector<1x32x32xf32>
    %24 = vector.shape_cast %23 : vector<1x32x32xf32> to vector<32x32xf32>
    %25 = vector.extract_strided_slice %18 {offsets = [3, 0, 0], sizes = [1, 32, 32], strides = [1, 1, 1]} : vector<4x32x32xf32> to vector<1x32x32xf32>
    %26 = vector.shape_cast %25 : vector<1x32x32xf32> to vector<32x32xf32>
    %27 = tpu.concatenate %20, %22, %24, %26 in 1 : vector<32x32xf32>, vector<32x32xf32>, vector<32x32xf32>, vector<32x32xf32> -> vector<32x128xf32>
    %28 = arith.truncf %27 : vector<32x128xf32> to vector<32x128xbf16>
    %c0_14 = arith.constant 0 : index
    %c0_15 = arith.constant 0 : index
    %29 = vector.load %arg6[%c0_14, %c0_15] : memref<128x128xbf16, #tpu.memory_space<vmem>>, vector<128x128xbf16>
    %cst_16 = arith.constant dense<0.000000e+00> : vector<32x128xf32>
    %30 = tpu.matmul %28, %29, %cst_16 {dimension_numbers = #tpu.dot_dimension_numbers<[1], [0], [0], [1], [0, 0, 1, 1], [], []>} : vector<32x128xbf16>, vector<128x128xbf16>, vector<32x128xf32> -> vector<32x128xf32>
    %c0_17 = arith.constant 0 : index
    %c0_18 = arith.constant 0 : index
    %31 = vector.load %arg7[%c0_17, %c0_18] : memref<1x128xf32, #tpu.memory_space<vmem>>, vector<1x128xf32>
    %32 = vector.broadcast %31 : vector<1x128xf32> to vector<32x128xf32>
    %33 = arith.addf %30, %32 : vector<32x128xf32>
    %c0_19 = arith.constant 0 : index
    %c0_20 = arith.constant 0 : index
    %c0_21 = arith.constant 0 : index
    %34 = vector.load %arg2[%c0_19, %c0_20, %c0_21] : memref<1x32x128xf32, #tpu.memory_space<vmem>>, vector<1x32x128xf32>
    %35 = vector.shape_cast %34 : vector<1x32x128xf32> to vector<32x128xf32>
    %36 = arith.truncf %35 : vector<32x128xf32> to vector<32x128xbf16>
    %c0_22 = arith.constant 0 : index
    %c0_23 = arith.constant 0 : index
    %37 = vector.load %arg8[%c0_22, %c0_23] : memref<128x256xbf16, #tpu.memory_space<vmem>>, vector<128x256xbf16>
    %cst_24 = arith.constant dense<0.000000e+00> : vector<32x256xf32>
    %38 = tpu.matmul %36, %37, %cst_24 {dimension_numbers = #tpu.dot_dimension_numbers<[1], [0], [0], [1], [0, 0, 1, 1], [], []>} : vector<32x128xbf16>, vector<128x256xbf16>, vector<32x256xf32> -> vector<32x256xf32>
    %39 = arith.truncf %33 : vector<32x128xf32> to vector<32x128xbf16>
    %c0_25 = arith.constant 0 : index
    %c0_26 = arith.constant 0 : index
    %40 = vector.load %arg9[%c0_25, %c0_26] : memref<128x256xbf16, #tpu.memory_space<vmem>>, vector<128x256xbf16>
    %cst_27 = arith.constant dense<0.000000e+00> : vector<32x256xf32>
    %41 = tpu.matmul %39, %40, %cst_27 {dimension_numbers = #tpu.dot_dimension_numbers<[1], [0], [0], [1], [0, 0, 1, 1], [], []>} : vector<32x128xbf16>, vector<128x256xbf16>, vector<32x256xf32> -> vector<32x256xf32>
    %42 = arith.addf %38, %41 : vector<32x256xf32>
    %c0_28 = arith.constant 0 : index
    %c0_29 = arith.constant 0 : index
    %43 = vector.load %arg10[%c0_28, %c0_29] : memref<1x256xf32, #tpu.memory_space<vmem>>, vector<1x256xf32>
    %44 = vector.broadcast %43 : vector<1x256xf32> to vector<32x256xf32>
    %45 = arith.addf %42, %44 : vector<32x256xf32>
    %46 = arith.truncf %45 : vector<32x256xf32> to vector<32x256xbf16>
    %c0_30 = arith.constant 0 : index
    %c0_31 = arith.constant 0 : index
    %c0_32 = arith.constant 0 : index
    %47 = vector.load %arg11[%c0_30, %c0_31, %c0_32] : memref<1x32x256xbf16, #tpu.memory_space<vmem>>, vector<1x32x256xbf16>
    %48 = vector.shape_cast %47 : vector<1x32x256xbf16> to vector<32x256xbf16>
    %49 = vector.shape_cast %46 : vector<32x256xbf16> to vector<1x32x256xbf16>
    tpu.vector_store %arg11[%c0_30, %c0_31, %c0_32], %49 {strides = array<i32>} : memref<1x32x256xbf16, #tpu.memory_space<vmem>>, vector<1x32x256xbf16>,
    %cst_33 = arith.constant dense<0.000000e+00> : vector<256xf32>
    %50 = vector.multi_reduction <add>, %45, %cst_33 [0] : vector<32x256xf32> to vector<256xf32>
    %51 = vector.shape_cast %50 : vector<256xf32> to vector<1x256xf32>
    %52 = arith.mulf %45, %45 : vector<32x256xf32>
    %cst_34 = arith.constant dense<0.000000e+00> : vector<256xf32>
    %53 = vector.multi_reduction <add>, %52, %cst_34 [0] : vector<32x256xf32> to vector<256xf32>
    %54 = vector.shape_cast %53 : vector<256xf32> to vector<1x256xf32>
    %55 = tpu.concatenate %51, %54 in 1 : vector<1x256xf32>, vector<1x256xf32> -> vector<1x512xf32>
    %c0_35 = arith.constant 0 : index
    %c0_36 = arith.constant 0 : index
    %c0_37 = arith.constant 0 : index
    %c0_38 = arith.constant 0 : index
    %56 = vector.load %arg12[%c0_35, %c0_36, %c0_37, %c0_38] : memref<1x1x1x512xf32, #tpu.memory_space<vmem>>, vector<1x1x1x512xf32>
    %57 = vector.shape_cast %56 : vector<1x1x1x512xf32> to vector<1x512xf32>
    %58 = vector.shape_cast %55 : vector<1x512xf32> to vector<1x1x1x512xf32>
    tpu.vector_store %arg12[%c0_35, %c0_36, %c0_37, %c0_38], %58 {strides = array<i32>} : memref<1x1x1x512xf32, #tpu.memory_space<vmem>>, vector<1x1x1x512xf32>,
    return
  }
  func.func @transform_0(%arg0: i32, %arg1: i32) -> (i32, i32, i32) {
    %c0_i32 = arith.constant 0 : i32
    %c0_i32_0 = arith.constant 0 : i32
    return %arg0, %arg1, %c0_i32 : i32, i32, i32
  }
  func.func @transform_1(%arg0: i32, %arg1: i32) -> (i32, i32, i32, i32) {
    %c0_i32 = arith.constant 0 : i32
    %c0_i32_0 = arith.constant 0 : i32
    %c0_i32_1 = arith.constant 0 : i32
    return %arg0, %c0_i32, %arg1, %c0_i32_0 : i32, i32, i32, i32
  }
  func.func @transform_2(%arg0: i32, %arg1: i32) -> (i32, i32, i32, i32) {
    %c0_i32 = arith.constant 0 : i32
    %c0_i32_0 = arith.constant 0 : i32
    %c0_i32_1 = arith.constant 0 : i32
    %c0_i32_2 = arith.constant 0 : i32
    return %arg0, %c0_i32, %c0_i32_0, %c0_i32_1 : i32, i32, i32, i32
  }
  func.func @transform_3(%arg0: i32, %arg1: i32) -> (i32, i32, i32, i32) {
    %c0_i32 = arith.constant 0 : i32
    %c0_i32_0 = arith.constant 0 : i32
    %c0_i32_1 = arith.constant 0 : i32
    %c0_i32_2 = arith.constant 0 : i32
    return %arg0, %c0_i32, %c0_i32_0, %c0_i32_1 : i32, i32, i32, i32
  }
  func.func @transform_4(%arg0: i32, %arg1: i32) -> (i32, i32) {
    %c0_i32 = arith.constant 0 : i32
    %c0_i32_0 = arith.constant 0 : i32
    %c0_i32_1 = arith.constant 0 : i32
    return %c0_i32, %c0_i32_0 : i32, i32
  }
  func.func @transform_5(%arg0: i32, %arg1: i32) -> (i32, i32) {
    %c0_i32 = arith.constant 0 : i32
    %c0_i32_0 = arith.constant 0 : i32
    %c0_i32_1 = arith.constant 0 : i32
    return %c0_i32, %c0_i32_0 : i32, i32
  }
  func.func @transform_6(%arg0: i32, %arg1: i32) -> (i32, i32) {
    %c0_i32 = arith.constant 0 : i32
    %c0_i32_0 = arith.constant 0 : i32
    %c0_i32_1 = arith.constant 0 : i32
    return %c0_i32, %c0_i32_0 : i32, i32
  }
  func.func @transform_7(%arg0: i32, %arg1: i32) -> (i32, i32) {
    %c0_i32 = arith.constant 0 : i32
    %c0_i32_0 = arith.constant 0 : i32
    %c0_i32_1 = arith.constant 0 : i32
    return %c0_i32, %c0_i32_0 : i32, i32
  }
  func.func @transform_8(%arg0: i32, %arg1: i32) -> (i32, i32) {
    %c0_i32 = arith.constant 0 : i32
    %c0_i32_0 = arith.constant 0 : i32
    %c0_i32_1 = arith.constant 0 : i32
    return %c0_i32, %c0_i32_0 : i32, i32
  }
  func.func @transform_9(%arg0: i32, %arg1: i32) -> (i32, i32, i32) {
    %c0_i32 = arith.constant 0 : i32
    %c0_i32_0 = arith.constant 0 : i32
    return %arg0, %arg1, %c0_i32 : i32, i32, i32
  }
  func.func @transform_10(%arg0: i32, %arg1: i32) -> (i32, i32, i32, i32) {
    %c0_i32 = arith.constant 0 : i32
    %c0_i32_0 = arith.constant 0 : i32
    %c0_i32_1 = arith.constant 0 : i32
    return %arg0, %arg1, %c0_i32, %c0_i32_0 : i32, i32, i32, i32
  }
}

module attributes {stable_mosaic.version = 11 : i64} {
  func.func @bn_relu_proj_kernel(%arg0: i32, %arg1: i32, %arg2: memref<1x32x256xbf16, #tpu.memory_space<vmem>>, %arg3: memref<1x256xf32, #tpu.memory_space<vmem>>, %arg4: memref<1x256xf32, #tpu.memory_space<vmem>>, %arg5: memref<256x128xbf16, #tpu.memory_space<vmem>>, %arg6: memref<1x128xf32, #tpu.memory_space<vmem>>, %arg7: memref<1x32x128xf32, #tpu.memory_space<vmem>>) attributes {dimension_semantics = [#tpu.dimension_semantics<parallel>, #tpu.dimension_semantics<parallel>], iteration_bounds = array<i64: 2, 1>, scalar_prefetch = 0 : i64, scratch_operands = 0 : i64, tpu.core_type = #tpu.core_type<tc>, window_params = [{transform_indices = @transform_0, window_bounds = array<i64: 1, 32, 256>}, {pipeline_mode = #tpu.pipeline_mode<synchronous>, transform_indices = @transform_1, window_bounds = array<i64: 1, 256>}, {pipeline_mode = #tpu.pipeline_mode<synchronous>, transform_indices = @transform_2, window_bounds = array<i64: 1, 256>}, {pipeline_mode = #tpu.pipeline_mode<synchronous>, transform_indices = @transform_3, window_bounds = array<i64: 256, 128>}, {pipeline_mode = #tpu.pipeline_mode<synchronous>, transform_indices = @transform_4, window_bounds = array<i64: 1, 128>}, {transform_indices = @transform_5, window_bounds = array<i64: 1, 32, 128>}]} {
    %c0 = arith.constant 0 : index
    %c0_0 = arith.constant 0 : index
    %c0_1 = arith.constant 0 : index
    %0 = vector.load %arg2[%c0, %c0_0, %c0_1] : memref<1x32x256xbf16, #tpu.memory_space<vmem>>, vector<1x32x256xbf16>
    %1 = vector.shape_cast %0 : vector<1x32x256xbf16> to vector<32x256xbf16>
    %2 = arith.extf %1 : vector<32x256xbf16> to vector<32x256xf32>
    %c0_2 = arith.constant 0 : index
    %c0_3 = arith.constant 0 : index
    %3 = vector.load %arg3[%c0_2, %c0_3] : memref<1x256xf32, #tpu.memory_space<vmem>>, vector<1x256xf32>
    %4 = vector.broadcast %3 : vector<1x256xf32> to vector<32x256xf32>
    %5 = arith.mulf %2, %4 : vector<32x256xf32>
    %c0_4 = arith.constant 0 : index
    %c0_5 = arith.constant 0 : index
    %6 = vector.load %arg4[%c0_4, %c0_5] : memref<1x256xf32, #tpu.memory_space<vmem>>, vector<1x256xf32>
    %7 = vector.broadcast %6 : vector<1x256xf32> to vector<32x256xf32>
    %8 = arith.addf %5, %7 : vector<32x256xf32>
    %cst = arith.constant 0.000000e+00 : f32
    %9 = vector.broadcast %cst : f32 to vector<32x256xf32>
    %10 = arith.maximumf %8, %9 : vector<32x256xf32>
    %11 = arith.truncf %10 : vector<32x256xf32> to vector<32x256xbf16>
    %c0_6 = arith.constant 0 : index
    %c0_7 = arith.constant 0 : index
    %12 = vector.load %arg5[%c0_6, %c0_7] : memref<256x128xbf16, #tpu.memory_space<vmem>>, vector<256x128xbf16>
    %cst_8 = arith.constant dense<0.000000e+00> : vector<32x128xf32>
    %13 = tpu.matmul %11, %12, %cst_8 {dimension_numbers = #tpu.dot_dimension_numbers<[1], [0], [0], [1], [0, 0, 1, 1], [], []>} : vector<32x256xbf16>, vector<256x128xbf16>, vector<32x128xf32> -> vector<32x128xf32>
    %c0_9 = arith.constant 0 : index
    %c0_10 = arith.constant 0 : index
    %14 = vector.load %arg6[%c0_9, %c0_10] : memref<1x128xf32, #tpu.memory_space<vmem>>, vector<1x128xf32>
    %15 = vector.broadcast %14 : vector<1x128xf32> to vector<32x128xf32>
    %16 = arith.addf %13, %15 : vector<32x128xf32>
    %c0_11 = arith.constant 0 : index
    %c0_12 = arith.constant 0 : index
    %c0_13 = arith.constant 0 : index
    %17 = vector.load %arg7[%c0_11, %c0_12, %c0_13] : memref<1x32x128xf32, #tpu.memory_space<vmem>>, vector<1x32x128xf32>
    %18 = vector.shape_cast %17 : vector<1x32x128xf32> to vector<32x128xf32>
    %19 = vector.shape_cast %16 : vector<32x128xf32> to vector<1x32x128xf32>
    tpu.vector_store %arg7[%c0_11, %c0_12, %c0_13], %19 {strides = array<i32>} : memref<1x32x128xf32, #tpu.memory_space<vmem>>, vector<1x32x128xf32>,
    return
  }
  func.func @transform_0(%arg0: i32, %arg1: i32) -> (i32, i32, i32) {
    %c0_i32 = arith.constant 0 : i32
    %c0_i32_0 = arith.constant 0 : i32
    return %arg0, %arg1, %c0_i32 : i32, i32, i32
  }
  func.func @transform_1(%arg0: i32, %arg1: i32) -> (i32, i32) {
    %c0_i32 = arith.constant 0 : i32
    %c0_i32_0 = arith.constant 0 : i32
    %c0_i32_1 = arith.constant 0 : i32
    return %c0_i32, %c0_i32_0 : i32, i32
  }
  func.func @transform_2(%arg0: i32, %arg1: i32) -> (i32, i32) {
    %c0_i32 = arith.constant 0 : i32
    %c0_i32_0 = arith.constant 0 : i32
    %c0_i32_1 = arith.constant 0 : i32
    return %c0_i32, %c0_i32_0 : i32, i32
  }
  func.func @transform_3(%arg0: i32, %arg1: i32) -> (i32, i32) {
    %c0_i32 = arith.constant 0 : i32
    %c0_i32_0 = arith.constant 0 : i32
    %c0_i32_1 = arith.constant 0 : i32
    return %c0_i32, %c0_i32_0 : i32, i32
  }
  func.func @transform_4(%arg0: i32, %arg1: i32) -> (i32, i32) {
    %c0_i32 = arith.constant 0 : i32
    %c0_i32_0 = arith.constant 0 : i32
    %c0_i32_1 = arith.constant 0 : i32
    return %c0_i32, %c0_i32_0 : i32, i32
  }
  func.func @transform_5(%arg0: i32, %arg1: i32) -> (i32, i32, i32) {
    %c0_i32 = arith.constant 0 : i32
    %c0_i32_0 = arith.constant 0 : i32
    return %arg0, %arg1, %c0_i32 : i32, i32, i32
  }
}

</mosaic_0001>

<bundles_post_ra>
// kernel: attentional_propagation.3
= control target key start
LH: loop header
LB: loop body
LE: loop exit
PB: predicated region body
PF: predicated region fallthrough
CT: control target
= control target key end

     0   :  { %s1617_s30 = smov 0   ;;  %s1619_s10 = smov 0   ;;  %s1756_s0 = inlined_call_operand.vmem [shape: f32[2,32,128], index: 0, kind: input, shape index: {}]   ;;  %s1757_s1 = inlined_call_operand.vmem [shape: bf16[4,128,32], index: 1, kind: input, shape index: {}]   ;;  %s1758_s2 = inlined_call_operand.vmem [shape: f32[4,1,32], index: 2, kind: input, shape index: {}]   ;;  %s1759_s3 = inlined_call_operand.vmem [shape: bf16[4,128,32], index: 3, kind: input, shape index: {}]   ;;  %s1760_s4 = inlined_call_operand.vmem [shape: f32[4,1,32], index: 4, kind: input, shape index: {}]   ;;  %s1761_s5 = inlined_call_operand.vmem [shape: bf16[4,128,32], index: 5, kind: input, shape index: {}]   ;;  %s1762_s6 = inlined_call_operand.vmem [shape: f32[4,1,32], index: 6, kind: input, shape index: {}]   ;;  %s1763_s7 = inlined_call_operand.vmem [shape: bf16[2,4,32,32], index: 7, kind: output, shape index: {0}]   ;;  %s1764_s8 = inlined_call_operand.vmem [shape: bf16[2,4,32,32], index: 8, kind: output, shape index: {1}]   ;;  %s1765_s9 = inlined_call_operand.vmem [shape: bf16[2,4,32,32], index: 9, kind: output, shape index: {2}]  }
   0x1   :  { %s1621_s11 = smov 0   ;;  %s1623_s12 = smov 0  }
   0x2   :  { %s1625_s13 = smov 0  }
   0x3 LB: > { %s32_s14 = sadd.s32 1, %s1557_s11  ;;  %s39_s15 = sadd.s32 1, %s1561_s12  ;;  %s1565_s13 = sphi %s1625_s13, %s20_s13   ;;  %s1561_s12 = sphi %s1623_s12, %s1769_s12   ;;  %s1557_s11 = sphi %s1621_s11, %s1768_s11   ;;  %s1553_s10 = sphi %s1619_s10, %s1767_s10   ;;  %s1549_s30 = sphi %s1617_s30, %s1766_s30  }
   0x4   : > { %p33_p0 = scmp.ge.s32.totalorder %s32_s14, 4  ;;  %p1298_p1 = scmp.ge.s32.totalorder %s1565_s13, 1 }
   0x5   : > { %p384_p2 = scmp.lt.s32.totalorder %s1565_s13, 9 }
   0x6   : > { %s1771_s14 = smov (%p33_p0, %s32_s14), 0  ;;  %s1773_s15 = smov (!%p33_p0, %s39_s15), %s1561_s12 }
   0x7   : > { %p385_p3 = pnand %p1298_p1, %p384_p2  ;;  %p41_p4 = scmp.ge.s32.totalorder %s1773_s15, 2 }
   0x8   : > { %p492_p5 = scmp.lt.s32.totalorder (!%p385_p3), %s1549_s30, 3  ;;  %p483_p6 = scmp.lt.s32.totalorder (!%p385_p3), %s1553_s10, 1  ;;  %vm945_vm0 = vcmask (!%p385_p3), 257024  }
   0x9   : > { %s1775_s15 = smov (%p41_p4, %s1773_s15), 0  ;;  %388 = sbr.rel (%p385_p3) target bundleno = 304 (0x130), region = 48 }
  0x10   : > { %s1777_s30 = smov (!%p492_p5, %s1549_s30), 3  ;;  %s1779_s10 = smov (!%p483_p6, %s1553_s10), 1 }
  0x11   : > { %s1358_s16 = sshll.u32 %s1777_s30, 6  ;;  %s1357_s20 = sshll.u32 %s1779_s10, 5 }
  0x12   : > { %s1655_s19 = scalar_lea.vmem %s1757_s1, %s1358_s16  ;;  %s1664_s23 = scalar_lea.vmem %s1759_s3, %s1358_s16 }
  0x13   : > { %v1503_v0 = vld [vmem:[%s1655_s19] sm:$0xff]   ;;  %v1504_v1 = vld [vmem:[%s1655_s19 + $0x8] sm:$0xff]   ;;  %v1505_v2 = vld [vmem:[%s1655_s19 + $0x10] sm:$0xff]   ;;  %s1669_s26 = scalar_lea.vmem %s1756_s0, %s1357_s20  ;;  %s1678_s29 = scalar_lea.vmem %s1761_s5, %s1358_s16 }
  0x14   : > { %1403 = vmatprep.subr.bf16.mxu0 %v1503_v0  ;;  %v1506_v3 = vld [vmem:[%s1655_s19 + $0x18] sm:$0xff]   ;;  %v1511_v4 = vld [vmem:[%s1664_s23] sm:$0xff]   ;;  %v560_v6 = vld [vmem:[%s1669_s26 + $0x8] sm:$0xff]  ;;  %s499_s18 = scalar_lea.vmem %s1758_s2, %s1777_s30  ;;  %s1307_s20 = sshll.u32 %s1777_s30, 2 }
  0x15   : > { %1404 = vmatpush3.bf16.msra.mxu0 %v1503_v0  ;;  %v559_v5 = vld [vmem:[%s1669_s26] sm:$0xff]  ;;  %1423 = vmatprep.subr.bf16.mxu1 %v1511_v4  ;;  %v1513_v9 = vld [vmem:[%s1664_s23 + $0x8] sm:$0xff]   ;;  %v1515_v10 = vld [vmem:[%s1664_s23 + $0x10] sm:$0xff]   ;;  %s507_s25 = scalar_lea.vmem %s1760_s4, %s1777_s30 }
  0x16   : > { %1405 = vmatprep.subr.bf16.mxu0 %v1504_v1  ;;  %v563_v7 = vpack.c.bf16 %v560_v6, %v559_v5  ;;  %v1507_v8 = vld [vmem:[%s1655_s19 + $0x20] sm:$0xff]   ;;  %1424 = vmatpush3.bf16.msra.mxu1 %v1511_v4  ;;  %v1508_v11 = vld [vmem:[%s1655_s19 + $0x28] sm:$0xff]   ;;  %v1517_v12 = vld [vmem:[%s1664_s23 + $0x18] sm:$0xff]  }
  0x17   : > { %1425 = vmatprep.subr.bf16.mxu1 %v1513_v9  ;;  %v1509_v13 = vld [vmem:[%s1655_s19 + $0x30] sm:$0xff]   ;;  %v1519_v14 = vld [vmem:[%s1664_s23 + $0x20] sm:$0xff]   ;;  %v1510_v15 = vld [vmem:[%s1655_s19 + $0x38] sm:$0xff]   ;;  %s1308_s19 = sshll.u32 %s1779_s10, 4 }
  0x18   : > { %1419 = vmatprep.mubr.bf16.mxu0 %v563_v7  ;;  %1439 = vmatprep.mubr.bf16.mxu1 %v563_v7  ;;  %v1521_v16 = vld [vmem:[%s1664_s23 + $0x28] sm:$0xff]   ;;  %v561_v17 = vld [vmem:[%s1669_s26 + $0x10] sm:$0xff]  ;;  %v562_v18 = vld [vmem:[%s1669_s26 + $0x18] sm:$0xff]  ;;  %s526_s21 = sadd.s32 %s1308_s19, %s1307_s20  ;;  %s515_s19 = scalar_lea.vmem %s1762_s6, %s1777_s30 }
  0x19   : > { %1406 = vmatpush3.bf16.msra.mxu0 %v1504_v1  ;;  %v1512_v19 = vld [vmem:[%s1678_s29] sm:$0xff]   ;;  %v1523_v20 = vld [vmem:[%s1664_s23 + $0x30] sm:$0xff]   ;;  %v564_v21 = vpack.c.bf16 %v562_v18, %v561_v17  ;;  %v1514_v22 = vld [vmem:[%s1678_s29 + $0x8] sm:$0xff]   ;;  %s1707_s22 = sshll.u32 %s526_s21, 2 }
  0x1a   : > { %1407 = vmatprep.subr.bf16.mxu0 %v1505_v2  ;;  %1426 = vmatpush3.bf16.msra.mxu1 %v1513_v9  ;;  %v1525_v23 = vld [vmem:[%s1664_s23 + $0x38] sm:$0xff]   ;;  %v1516_v24 = vld [vmem:[%s1678_s29 + $0x10] sm:$0xff]   ;;  %v1520_v26 = vld [vmem:[%s1678_s29 + $0x20] sm:$0xff]   ;;  %s528_s27 = scalar_lea.vmem %s1763_s7, %s1707_s22  ;;  %s542_s16 = scalar_lea.vmem %s1764_s8, %s1707_s22 }
  0x1b   : > { %1427 = vmatprep.subr.bf16.mxu1 %v1515_v10  ;;  %v1518_v25 = vld [vmem:[%s1678_s29 + $0x18] sm:$0xff]   ;;  %v1522_v27 = vld [vmem:[%s1678_s29 + $0x28] sm:$0xff]   ;;  %v1524_v28 = vld [vmem:[%s1678_s29 + $0x30] sm:$0xff]   ;;  %s556_s23 = scalar_lea.vmem %s1765_s9, %s1707_s22 }
  0x1c   : > { %v1526_v29 = vld [vmem:[%s1678_s29 + $0x38] sm:$0xff]   ;;  %v1316_v30 = vld [vmem:[%s499_s18] ss:$0 sm:$0xff] }
  0x1d   : > { %1408 = vmatpush3.bf16.msra.mxu0 %v1505_v2  ;;  %v1325_v45 = vld [vmem:[%s507_s25] ss:$0 sm:$0xff] }
  0x1e   : > { %1409 = vmatprep.subr.bf16.mxu0 %v1506_v3  ;;  %1428 = vmatpush3.bf16.msra.mxu1 %v1515_v10  ;;  %v1334_v60 = vld [vmem:[%s515_s19] ss:$0 sm:$0xff] }
  0x1f   : > { %1429 = vmatprep.subr.bf16.mxu1 %v1517_v12 }
  0x21   : > { %1410 = vmatpush3.bf16.msra.mxu0 %v1506_v3 }
  0x22   : > { %1411 = vmatprep.subr.bf16.mxu0 %v1507_v8  ;;  %1430 = vmatpush3.bf16.msra.mxu1 %v1517_v12 }
  0x23   : > { %1431 = vmatprep.subr.bf16.mxu1 %v1519_v14 }
  0x25   : > { %1412 = vmatpush3.bf16.msra.mxu0 %v1507_v8 }
  0x26   : > { %1413 = vmatprep.subr.bf16.mxu0 %v1508_v11  ;;  %1432 = vmatpush3.bf16.msra.mxu1 %v1519_v14 }
  0x27   : > { %1433 = vmatprep.subr.bf16.mxu1 %v1521_v16 }
  0x29   : > { %1414 = vmatpush3.bf16.msra.mxu0 %v1508_v11 }
  0x2a   : > { %1415 = vmatprep.subr.bf16.mxu0 %v1509_v13  ;;  %1434 = vmatpush3.bf16.msra.mxu1 %v1521_v16 }
  0x2b   : > { %1435 = vmatprep.subr.bf16.mxu1 %v1523_v20 }
  0x2d   : > { %1416 = vmatpush3.bf16.msra.mxu0 %v1509_v13 }
  0x2e   : > { %1417 = vmatprep.subr.bf16.mxu0 %v1510_v15  ;;  %1436 = vmatpush3.bf16.msra.mxu1 %v1523_v20 }
  0x2f   : > { %1437 = vmatprep.subr.bf16.mxu1 %v1525_v23 }
  0x31   : > { %1418 = vmatpush3.bf16.msra.mxu0 %v1510_v15 }
  0x32   : > { %1443 = vmatprep.subr.bf16.mxu0 %v1512_v19  ;;  %1438 = vmatpush3.bf16.msra.mxu1 %v1525_v23 }
  0x34   : > { %1420 = vmatmul.mubr.bf16.vlgmr.msra.gmra.mrb[0].mxu0 %v564_v21 }
  0x35   : > { %1444 = vmatpush3.bf16.msra.mxu0 %v1512_v19  ;;  %1459 = vmatprep.mubr.bf16.mxu0 %v563_v7 }
  0x36   : > { %1445 = vmatprep.subr.bf16.mxu0 %v1514_v22  ;;  %1440 = vmatmul.mubr.bf16.vlgmr.msra.gmra.mrb[0].mxu1 %v564_v21 }
  0x39   : > { %1446 = vmatpush3.bf16.msra.mxu0 %v1514_v22 }
  0x3a   : > { %1447 = vmatprep.subr.bf16.mxu0 %v1516_v24 }
  0x3d   : > { %1448 = vmatpush3.bf16.msra.mxu0 %v1516_v24 }
  0x3e   : > { %1449 = vmatprep.subr.bf16.mxu0 %v1518_v25 }
  0x41   : > { %1450 = vmatpush3.bf16.msra.mxu0 %v1518_v25 }
  0x42   : > { %1451 = vmatprep.subr.bf16.mxu0 %v1520_v26 }
  0x45   : > { %1452 = vmatpush3.bf16.msra.mxu0 %v1520_v26 }
  0x46   : > { %1453 = vmatprep.subr.bf16.mxu0 %v1522_v27 }
  0x49   : > { %1454 = vmatpush3.bf16.msra.mxu0 %v1522_v27 }
  0x4a   : > { %1455 = vmatprep.subr.bf16.mxu0 %v1524_v28 }
  0x4d   : > { %1456 = vmatpush3.bf16.msra.mxu0 %v1524_v28 }
  0x4e   : > { %1457 = vmatprep.subr.bf16.mxu0 %v1526_v29 }
  0x51   : > { %1458 = vmatpush3.bf16.msra.mxu0 %v1526_v29 }
  0x54   : > { %1460 = vmatmul.mubr.bf16.vlgmr.msra.gmra.mrb[4].mxu0 %v564_v21 }
 0x107   : > { %v1421_v31 = vpop.f32.mrb[0].mxu0 }
 0x108   : > { %v679_v32 = vadd.f32 %v1421_v31, %v1316_v30  ;;  %v670_v33 = vpop.f32.mrb[1].mxu0 }
 0x109   : > { %v671_v34 = vadd.f32 %v1316_v30, %v670_v33  ;;  %v1422_v35 = vpop.f32.mrb[2].mxu0  ;;  %v1441_v48 = vpop.f32.mrb[0].mxu1 }
 0x10a   : > { %v687_v36 = vmul.f32 0.17677669, %v679_v32  ;;  %v682_v37 = vadd.f32 %v1422_v35, %v1316_v30  ;;  %v673_v38 = vpop.f32.mrb[3].mxu0  ;;  %v803_v49 = vadd.f32 %v1441_v48, %v1325_v45  ;;  %v794_v50 = vpop.f32.mrb[1].mxu1 }
 0x10b   : > { %v685_v39 = vmul.f32 0.17677669, %v671_v34  ;;  %v674_v40 = vadd.f32 %v1316_v30, %v673_v38  ;;  %v795_v51 = vadd.f32 %v1325_v45, %v794_v50  ;;  %v1442_v52 = vpop.f32.mrb[2].mxu1 }
 0x10c   : > { %v1363_v41 = vpack.c.bf16 %v687_v36, %v687_v36  ;;  %v688_v42 = vmul.f32 0.17677669, %v682_v37  ;;  %v1367_v53 = vpack.c.bf16 %v803_v49, %v803_v49  ;;  %v806_v54 = vadd.f32 %v1442_v52, %v1325_v45  ;;  %v797_v55 = vpop.f32.mrb[3].mxu1 }
 0x10d   : > { %v1361_v43 = vpack.c.bf16 %v685_v39, %v685_v39  ;;  %v686_v44 = vmul.f32 0.17677669, %v674_v40  ;;  %v1365_v56 = vpack.c.bf16 %v795_v51, %v795_v51  ;;  %v798_v57 = vadd.f32 %v1325_v45, %v797_v55 }
 0x10e   : > { %948 = vst.msk [vmem:[%s528_s27 + $0x8] sm:$0xf] %vm945_vm0, %v1363_v41  ;;  %v1364_v46 = vpack.c.bf16 %v688_v42, %v688_v42  ;;  %968 = vst.msk [vmem:[%s542_s16 + $0x8] sm:$0xf] %vm945_vm0, %v1367_v53  ;;  %v1368_v58 = vpack.c.bf16 %v806_v54, %v806_v54 }
 0x10f   : > { %946 = vst.msk [vmem:[%s528_s27] sm:$0xf] %vm945_vm0, %v1361_v43  ;;  %v1362_v47 = vpack.c.bf16 %v686_v44, %v686_v44  ;;  %966 = vst.msk [vmem:[%s542_s16] sm:$0xf] %vm945_vm0, %v1365_v56  ;;  %v1366_v59 = vpack.c.bf16 %v798_v57, %v798_v57 }
 0x110   : > { %949 = vst.msk [vmem:[%s528_s27 + $0xc] sm:$0xf] %vm945_vm0, %v1364_v46  ;;  %969 = vst.msk [vmem:[%s542_s16 + $0xc] sm:$0xf] %vm945_vm0, %v1368_v58 }
 0x111   : > { %947 = vst.msk [vmem:[%s528_s27 + $0x4] sm:$0xf] %vm945_vm0, %v1362_v47  ;;  %967 = vst.msk [vmem:[%s542_s16 + $0x4] sm:$0xf] %vm945_vm0, %v1366_v59 }
 0x127   : > { %v1461_v61 = vpop.f32.mrb[4].mxu0 }
 0x128   : > { %v923_v62 = vadd.f32 %v1461_v61, %v1334_v60  ;;  %v914_v63 = vpop.f32.mrb[5].mxu0 }
 0x129   : > { %v915_v0 = vadd.f32 %v1334_v60, %v914_v63  ;;  %v1462_v1 = vpop.f32.mrb[6].mxu0 }
 0x12a   : > { %v1371_v2 = vpack.c.bf16 %v923_v62, %v923_v62  ;;  %v926_v3 = vadd.f32 %v1462_v1, %v1334_v60  ;;  %v917_v4 = vpop.f32.mrb[7].mxu0 }
 0x12b   : > { %v1369_v5 = vpack.c.bf16 %v915_v0, %v915_v0  ;;  %v918_v6 = vadd.f32 %v1334_v60, %v917_v4 }
 0x12c   : > { %988 = vst.msk [vmem:[%s556_s23 + $0x8] sm:$0xf] %vm945_vm0, %v1371_v2  ;;  %v1372_v7 = vpack.c.bf16 %v926_v3, %v926_v3 }
 0x12d   : > { %986 = vst.msk [vmem:[%s556_s23] sm:$0xf] %vm945_vm0, %v1369_v5  ;;  %v1370_v8 = vpack.c.bf16 %v918_v6, %v918_v6 }
 0x12e   : > { %989 = vst.msk [vmem:[%s556_s23 + $0xc] sm:$0xf] %vm945_vm0, %v1372_v7 }
 0x12f   : > { %987 = vst.msk [vmem:[%s556_s23 + $0x4] sm:$0xf] %vm945_vm0, %v1370_v8 }
 0x130 PF: > { %s20_s13 = sadd.s32 1, %s1565_s13   ;;  %s1766_s30 = smov %s1557_s11 }
 0x131   : > { %p17_p7 = scmp.ge.s32.totalorder %s20_s13, 10   ;;  %s1767_s10 = smov %s1561_s12 }
 0x132   : > { %s1768_s11 = smov %s1771_s14  ;;  %s1769_s12 = smov %s1775_s15 }
 0x133   :  { %19 = sbr.rel (!%p17_p7) target bundleno = 3 (0x3), region = 120 }

// kernel: attentional_propagation.5
= control target key start
LH: loop header
LB: loop body
LE: loop exit
PB: predicated region body
PF: predicated region fallthrough
CT: control target
= control target key end

     0   :  { %10 = vsyncpa [#allocation3], 0  ;;  %s1042_s0 = inlined_call_operand.vmem [shape: bf16[2,32,256], index: 0, kind: input, shape index: {}]   ;;  %s1043_s1 = inlined_call_operand.vmem [shape: f32[1,256], index: 1, kind: input, shape index: {}]   ;;  %s1044_s2 = inlined_call_operand.vmem [shape: f32[1,256], index: 2, kind: input, shape index: {}]   ;;  %s1045_s3 = inlined_call_operand.vmem [shape: bf16[256,128], index: 3, kind: input, shape index: {}]   ;;  %s1046_s4 = inlined_call_operand.vmem [shape: f32[1,128], index: 4, kind: input, shape index: {}]   ;;  %s1047_s5 = inlined_call_operand.hbm [shape: f32[2,32,128], index: 5, kind: output, shape index: {}]  }
   0x1   :  { %12 = vsyncpa [#allocation3 + $0x1], 0  ;;  %s870_s18 = smov 0   ;;  %s872_s19 = smov 0  }
   0x2   :  { %s874_s20 = smov 0   ;;  %s876_s21 = smov 0  }
   0x3   :  { %s878_s22 = smov 0   ;;  %s880_s23 = smov 0  }
   0x4 LB: > { %s608_s24 = sadd.s32 4294967295, %s835_s23   ;;  %s609_s25 = sadd.s32 4294967294, %s835_s23   ;;  %s835_s23 = sphi %s880_s23, %s18_s23   ;;  %s831_s22 = sphi %s878_s22, %s1054_s22   ;;  %s827_s21 = sphi %s876_s21, %s1053_s21   ;;  %s823_s20 = sphi %s874_s20, %s1052_s20   ;;  %s819_s19 = sphi %s872_s19, %s1051_s19   ;;  %s815_s18 = sphi %s870_s18, %s1050_s18  }
   0x5   : > { %s30_s26 = sadd.s32 1, %s831_s22  ;;  %s151_s27 = sadd.s32 1, %s823_s20 }
   0x6   : > { %p32_p0 = scmp.ge.s32.totalorder %s30_s26, 2  ;;  %p161_p1 = scmp.ne.s32.totalorder %s823_s20, %s819_s19 }
   0x7   : > { %p162_p2 = scmp.eq.s32.totalorder %s608_s24, 1  ;;  %p167_p3 = scmp.ne.s32.totalorder %s819_s19, %s815_s18 }
   0x8   : > { %s1056_s26 = smov (%p32_p0, %s30_s26), 0  ;;  %p168_p5 = scmp.eq.s32.totalorder %s609_s25, 1 }
   0x9   : > { %p910_p4 = por %p162_p2, %p161_p1  ;;  %s146_s29 = ssub.s32 %s831_s22, %s1056_s26 }
   0xa   : > { %p612_p6 = scmp.ge.s32.totalorder %s835_s23, 1  ;;  %p149_p7 = scmp.eq.s32.totalorder %s146_s29, 0 }
   0xb   : > { %p917_p8 = por %p168_p5, %p167_p3  ;;  %p212_p9 = scmp.lt.s32.totalorder %s835_s23, 3 }
   0xc   : > { %s923_s6 = scalar_select %p149_p7, %s823_s20, %s151_s27  }
   0xd   : > { %p213_p10 = pnand %p612_p6, %p212_p9 }
   0xe   : > { %v741_v0 = vld [vmem:[%s1045_s3 + $0x40] sm:$0xff] (!%p213_p10)   ;;  %v743_v2 = vld [vmem:[%s1045_s3 + $0x48] sm:$0xff] (!%p213_p10)   ;;  %p246_p11 = scmp.lt.s32.totalorder (!%p213_p10), %s827_s21, 1  ;;  %v745_v4 = vld [vmem:[%s1045_s3 + $0x50] sm:$0xff] (!%p213_p10)   ;;  %v272_v5 = vlaneseq (!%p213_p10)  ;;  %s242_s24 = sand.u32 (!%p213_p10), 1, %s819_s19  }
   0xf   : > { %216 = sbr.rel (%p213_p10) target bundleno = 281 (0x119), region = 40  ;;  %v742_v1 = vld [vmem:[%s1045_s3] sm:$0xff] (!%p213_p10)   ;;  %640 = vmatprep.subr.bf16.mxu0 (!%p213_p10), %v741_v0  ;;  %668 = vmatprep.subr.bf16.mxu1 (!%p213_p10), %v741_v0  ;;  %v744_v3 = vld [vmem:[%s1045_s3 + $0x8] sm:$0xff] (!%p213_p10)   ;;  %v746_v6 = vld [vmem:[%s1045_s3 + $0x10] sm:$0xff] (!%p213_p10)   ;;  %s613_s25 = sshll.u32 (!%p213_p10), %s242_s24, 5 }
  0x10   : > { %641 = vmatpush3.bf16.msra.mxu0 (!%p213_p10), %v742_v1  ;;  %676 = vmatpush3.bf16.msra.mxu1 (!%p213_p10), %v742_v1  ;;  %v747_v7 = vld [vmem:[%s1045_s3 + $0x58] sm:$0xff] (!%p213_p10)   ;;  %v273_v8 = vshrl.u32 (!%p213_p10), %v272_v5, 7  ;;  %v749_v10 = vld [vmem:[%s1045_s3 + $0x60] sm:$0xff] (!%p213_p10)   ;;  %v751_v14 = vld [vmem:[%s1045_s3 + $0x68] sm:$0xff] (!%p213_p10)   ;;  %s639_s9 = sshll.u32 (!%p213_p10), %s827_s21, 9 }
  0x11   : > { %642 = vmatprep.subr.bf16.mxu0 (!%p213_p10), %v743_v2  ;;  %669 = vmatprep.subr.bf16.mxu1 (!%p213_p10), %v743_v2  ;;  %v748_v9 = vld [vmem:[%s1045_s3 + $0x18] sm:$0xff] (!%p213_p10)   ;;  %v750_v12 = vld [vmem:[%s1045_s3 + $0x20] sm:$0xff] (!%p213_p10)   ;;  %v752_v29 = vld [vmem:[%s1045_s3 + $0x28] sm:$0xff] (!%p213_p10)   ;;  %s994_s12 = scalar_lea.hbm (!%p213_p10), %s1047_s5, %s639_s9 }
  0x12   : > { %v274_v11 = vsub.s32 (!%p213_p10), 0, %v273_v8  ;;  %v278_v13 = vsub.s32 (!%p213_p10), 1, %v273_v8  ;;  %v270_v17 = vld [vmem:[%s1043_s1] sm:$0x3] (!%p213_p10)  ;;  %v753_v34 = vld [vmem:[%s1045_s3 + $0x70] sm:$0xff] (!%p213_p10)   ;;  %v755_v50 = vld [vmem:[%s1045_s3 + $0x78] sm:$0xff] (!%p213_p10)  }
  0x13   : > { %v290_v22 = vld [vmem:[%s1044_s2] sm:$0x3] (!%p213_p10)  ;;  %v754_v46 = vld [vmem:[%s1045_s3 + $0x30] sm:$0xff] (!%p213_p10)   ;;  %v756_v61 = vld [vmem:[%s1045_s3 + $0x38] sm:$0xff] (!%p213_p10)  }
  0x14   : > { %643 = vmatpush3.bf16.msra.mxu0 (!%p213_p10), %v744_v3  ;;  %677 = vmatpush3.bf16.msra.mxu1 (!%p213_p10), %v744_v3  ;;  %v275_v25 = vrot.slane (!%p213_p10), %v270_v17, %v274_v11  ;;  %v279_v26 = vrot.slane (!%p213_p10), %v270_v17, %v278_v13  ;;  %v295_v27 = vrot.slane (!%p213_p10), %v290_v22, %v274_v11 }
  0x15   : > { %644 = vmatprep.subr.bf16.mxu0 (!%p213_p10), %v745_v4  ;;  %670 = vmatprep.subr.bf16.mxu1 (!%p213_p10), %v745_v4  ;;  %v299_v28 = vrot.slane (!%p213_p10), %v290_v22, %v278_v13  ;;  %v616_v4 = vld [vmem:[%s1046_s4] ss:$0 sm:$0xff] (!%p213_p10) }
  0x16   : > { %s247_s17 = scalar_select %p246_p11, %s827_s21, 1 }
  0x17   : > { %s996_s21 = scalar_lea.sflag [#allocation3], %s242_s24 }
  0x18   : > { %s638_s7 = sshll.u32 %s247_s17, 5  ;;  %645 = vmatpush3.bf16.msra.mxu0 %v746_v6  ;;  %678 = vmatpush3.bf16.msra.mxu1 %v746_v6 }
  0x19   : > { %646 = vmatprep.subr.bf16.mxu0 %v747_v7  ;;  %671 = vmatprep.subr.bf16.mxu1 %v747_v7  ;;  %s254_s14 = scalar_lea.vmem %s1042_s0, %s638_s7  ;;  %s244_s7 = scalar_lea.vmem [#allocation2], %s613_s25 }
  0x1a   : > { %v258_v15 = vld [vmem:[%s254_s14] sm:$0xff]  ;;  %v259_v16 = vld [vmem:[%s254_s14 + $0x8] sm:$0xff]  ;;  %v260_v23 = vld [vmem:[%s254_s14 + $0x10] sm:$0xff]  ;;  %s526_s8 = sshll.u32 %s244_s7, 4  ;;  %s989_s8 = int_to_ptr.vmem [resolvable:$true] %s526_s8 }
  0x1b   : > { %v262_v18 = vunpack.c.l.bf16 %v258_v15  ;;  %v263_v19 = vunpack.c.h.bf16 %v258_v15  ;;  %v264_v20 = vunpack.c.l.bf16 %v259_v16  ;;  %v265_v21 = vunpack.c.h.bf16 %v259_v16  ;;  %v261_v24 = vld [vmem:[%s254_s14 + $0x18] sm:$0xff]  ;;  %s757_s13 = scalar_lea.vmem %s989_s8, 512  ;;  %s837_s14 = smov [#allocation2]  }
  0x1c   : > { %647 = vmatpush3.bf16.msra.mxu0 %v748_v9  ;;  %679 = vmatpush3.bf16.msra.mxu1 %v748_v9  ;;  %v266_v30 = vunpack.c.l.bf16 %v260_v23  ;;  %v267_v31 = vunpack.c.h.bf16 %v260_v23  ;;  %v268_v32 = vunpack.c.l.bf16 %v261_v24  ;;  %v269_v33 = vunpack.c.h.bf16 %v261_v24  ;;  %p758_p12 = scmp.ne.s32.totalorder %s989_s8, %s757_s13  ;;  %s761_s15 = sshll.u32 %s837_s14, 4  ;;  %s762_s15 = int_to_ptr.vmem [resolvable:$false] %s761_s15 }
  0x1d   : > { %648 = vmatprep.subr.bf16.mxu0 %v749_v10  ;;  %672 = vmatprep.subr.bf16.mxu1 %v749_v10  ;;  %v283_v35 = vmul.f32 %v279_v26, %v263_v19  ;;  %v285_v36 = vmul.f32 %v279_v26, %v265_v21  ;;  %v282_v37 = vmul.f32 %v275_v25, %v262_v18  ;;  %s763_s16 = scalar_lea.vmem %s762_s15, 1024  ;;  %p764_p1 = scmp.lt.s32.totalorder %s989_s8, %s762_s15 }
  0x1e   : > { %v287_v38 = vmul.f32 %v279_v26, %v267_v31  ;;  %v289_v39 = vmul.f32 %v279_v26, %v269_v33  ;;  %v284_v40 = vmul.f32 %v275_v25, %v264_v20  ;;  %v286_v41 = vmul.f32 %v275_v25, %v266_v30  ;;  %p759_p13 = pnand %p758_p12, %p910_p4  ;;  %p765_p2 = scmp.lt.s32.totalorder %s763_s16, %s757_s13 }
  0x1f   : > { %v303_v42 = vadd.f32 %v299_v28, %v283_v35  ;;  %v305_v43 = vadd.f32 %v299_v28, %v285_v36  ;;  %v302_v44 = vadd.f32 %v295_v27, %v282_v37  ;;  %v288_v45 = vmul.f32 %v275_v25, %v268_v32 }
  0x20   : > { %649 = vmatpush3.bf16.msra.mxu0 %v750_v12  ;;  %680 = vmatpush3.bf16.msra.mxu1 %v750_v12  ;;  %v307_v47 = vadd.f32 %v299_v28, %v287_v38  ;;  %v309_v48 = vadd.f32 %v299_v28, %v289_v39  ;;  %v304_v49 = vadd.f32 %v295_v27, %v284_v40  ;;  %p760_p0 = pneg %p759_p13  ;;  %p766_p3 = por %p765_p2, %p764_p1 }
  0x21   : > { %650 = vmatprep.subr.bf16.mxu0 %v751_v14  ;;  %673 = vmatprep.subr.bf16.mxu1 %v751_v14  ;;  %v311_v51 = vmax.f32 %v303_v42, 0.0  ;;  %v313_v52 = vmax.f32 %v305_v43, 0.0  ;;  %v306_v53 = vadd.f32 %v295_v27, %v286_v41  ;;  %v308_v56 = vadd.f32 %v295_v27, %v288_v45 }
  0x22   : > { %v315_v54 = vmax.f32 %v307_v47, 0.0  ;;  %v317_v55 = vmax.f32 %v309_v48, 0.0  ;;  %v310_v58 = vmax.f32 %v302_v44, 0.0  ;;  %v312_v59 = vmax.f32 %v304_v49, 0.0  ;;  %p767_p5 = pnand %p766_p3, %p760_p0 }
  0x23   : > { %v319_v57 = vpack.c.bf16 %v313_v52, %v311_v51  ;;  %v314_v60 = vmax.f32 %v306_v53, 0.0  ;;  %v316_v63 = vmax.f32 %v308_v56, 0.0 }
  0x24   : > { %651 = vmatpush3.bf16.msra.mxu0 %v752_v29  ;;  %681 = vmatpush3.bf16.msra.mxu1 %v752_v29  ;;  %v321_v62 = vpack.c.bf16 %v317_v55, %v315_v54  ;;  %v318_v0 = vpack.c.bf16 %v312_v59, %v310_v58 }
  0x25   : > { %652 = vmatprep.subr.bf16.mxu0 %v753_v34  ;;  %674 = vmatprep.subr.bf16.mxu1 %v753_v34  ;;  %v320_v1 = vpack.c.bf16 %v316_v63, %v314_v60 }
  0x26   : > { %489 = vmatprep.mubr.bf16.mxu0 %v319_v57  ;;  %497 = vmatprep.mubr.bf16.mxu1 %v321_v62 }
  0x28   : > { %653 = vmatpush3.bf16.msra.mxu0 %v754_v46  ;;  %682 = vmatpush3.bf16.msra.mxu1 %v754_v46 }
  0x29   : > { %654 = vmatprep.subr.bf16.mxu0 %v755_v50  ;;  %675 = vmatprep.subr.bf16.mxu1 %v755_v50 }
  0x2c   : > { %655 = vmatpush3.bf16.msra.mxu0 %v756_v61  ;;  %683 = vmatpush3.bf16.msra.mxu1 %v756_v61 }
  0x2f   : > { %490 = vmatmul.mubr.bf16.vlgmr.msra.gmra.mrb[0].mxu0 %v318_v0  ;;  %498 = vmatmul.mubr.bf16.vlgmr.msra.gmra.mrb[0].mxu1 %v320_v1 }
 0x102   : > { %v656_v2 = vpop.f32.mrb[0].mxu0  ;;  %v662_v3 = vpop.f32.mrb[0].mxu1 }
 0x103   : > { %v657_v5 = vpop.f32.mrb[1].mxu0  ;;  %v663_v6 = vpop.f32.mrb[1].mxu1 }
 0x104   : > { %v658_v7 = vadd.f32 %v657_v5, %v656_v2  ;;  %v664_v8 = vadd.f32 %v663_v6, %v662_v3  ;;  %v659_v9 = vpop.f32.mrb[2].mxu0  ;;  %v665_v10 = vpop.f32.mrb[2].mxu1 }
 0x105   : > { %v660_v11 = vpop.f32.mrb[3].mxu0  ;;  %v666_v12 = vpop.f32.mrb[3].mxu1 }
 0x106   : > { %v492_v13 = vadd.f32 %v658_v7, %v616_v4  ;;  %v500_v14 = vadd.f32 %v664_v8, %v616_v4  ;;  %v661_v15 = vadd.f32 %v660_v11, %v659_v9  ;;  %v667_v16 = vadd.f32 %v666_v12, %v665_v10 }
 0x108   : > { %506 = vst [vmem:[%s244_s7] sm:$0xff] %v492_v13  ;;  %508 = vst [vmem:[%s244_s7 + $0x10] sm:$0xff] %v500_v14  ;;  %v495_v17 = vadd.f32 %v661_v15, %v616_v4  ;;  %v503_v18 = vadd.f32 %v667_v16, %v616_v4 }
 0x10a   : > { %507 = vst [vmem:[%s244_s7 + $0x8] sm:$0xff] %v495_v17  ;;  %509 = vst [vmem:[%s244_s7 + $0x18] sm:$0xff] %v503_v18 }
 0x10b   : > { %770 = shalt.err (!%p767_p5)
}
 0x10c   : > { %s771_s17 = scalar_lea.hbm %s994_s12, 512  ;;  %s775_s27 = scalar_lea.hbm %s1047_s5, 1024 }
 0x10d   : > { %p772_p6 = scmp.ne.s32.totalorder %s994_s12, %s771_s17  ;;  %p776_p10 = scmp.lt.u32.totalorder %s994_s12, %s1047_s5 }
 0x10e   : > { %p777_p11 = scmp.lt.u32.totalorder %s775_s27, %s771_s17  ;;  %p779_p13 = scmp.lt.u32.totalorder %s771_s17, %s994_s12 }
 0x10f   : > { %p773_p7 = pnand %p772_p6, %p910_p4 }
 0x110   : > { %p778_p12 = por %p777_p11, %p776_p10 }
 0x111   : > { %p774_p9 = pneg %p773_p7 }
 0x112   : > { %p780_p0 = por %p779_p13, %p778_p12 }
 0x114   : > { %p781_p1 = pnand %p780_p0, %p774_p9 }
 0x116   : > { %784 = shalt.err (!%p781_p1)
}
 0x117   : > { %s838_s9 = smov 128   ;;  %s839_s10 = smov 8  }
 0x118   : > { %684 = dma.vmem_to_hbm [thread:$0]  (%p910_p4), %s989_s8, 512, %s994_s12, %s996_s21, %s838_s9, %s838_s9, %s839_s10  }
 0x119 PF: > { %p690_p2 = scmp.ge.s32.totalorder %s835_s23, 2  ;;  %s541_s11 = sand.u32 1, %s815_s18  }
 0x11a   : > { %s542_s13 = scalar_lea.sflag [#allocation3], %s541_s11 }
 0x11b   : > { %p687_p3 = pnand %p690_p2, %p917_p8 }
 0x11d   : > { %810 = dma.done.wait (!%p687_p3), %s542_s13, 512  }
 0x11e   : > { %812 = vsyncadd (!%p687_p3), %s542_s13, 4294966784  ;;  %s18_s23 = sadd.s32 1, %s835_s23   ;;  %s1050_s18 = smov %s819_s19 }
 0x11f   : > { %p15_p5 = scmp.ge.s32.totalorder %s18_s23, 4   ;;  %s1051_s19 = smov %s823_s20 }
 0x120   : > { %s1052_s20 = smov %s923_s6  ;;  %s1053_s21 = smov %s831_s22 }
 0x121   : > { %s1054_s22 = smov %s1056_s26  ;;  %17 = sbr.rel (!%p15_p5) target bundleno = 4 (0x4), region = 75 }
 0x128   :  { %547 = vsyncpa [#allocation3], 1 }
 0x129   :  { %549 = vsyncpa [#allocation3 + $0x1], 1 }

// kernel: attentional_propagation.4
= control target key start
LH: loop header
LB: loop body
LE: loop exit
PB: predicated region body
PF: predicated region fallthrough
CT: control target
= control target key end

     0   :  { %s2663_s13 = smov 0   ;;  %s2665_s14 = smov 0   ;;  %s3083_s0 = inlined_call_operand.vmem [shape: f32[2,32,128], index: 0, kind: input, shape index: {}]   ;;  %s3084_s1 = inlined_call_operand.vmem [shape: bf16[2,4,32,32], index: 1, kind: input, shape index: {}]   ;;  %s3085_s2 = inlined_call_operand.vmem [shape: bf16[2,4,32,32], index: 2, kind: input, shape index: {}]   ;;  %s3086_s3 = inlined_call_operand.vmem [shape: bf16[2,4,32,32], index: 3, kind: input, shape index: {}]   ;;  %s3087_s4 = inlined_call_operand.vmem [shape: bf16[128,128], index: 4, kind: input, shape index: {}]   ;;  %s3088_s5 = inlined_call_operand.vmem [shape: f32[1,128], index: 5, kind: input, shape index: {}]   ;;  %s3089_s6 = inlined_call_operand.vmem [shape: bf16[128,256], index: 6, kind: input, shape index: {}]   ;;  %s3090_s7 = inlined_call_operand.vmem [shape: bf16[128,256], index: 7, kind: input, shape index: {}]   ;;  %s3091_s8 = inlined_call_operand.vmem [shape: f32[1,256], index: 8, kind: input, shape index: {}]   ;;  %s3092_s9 = inlined_call_operand.vmem [shape: bf16[2,32,256], index: 9, kind: output, shape index: {0}]   ;;  %s3093_s10 = inlined_call_operand.vmem [shape: f32[2,1,1,512], index: 10, kind: output, shape index: {1}]  }
   0x1   :  { %s2667_s15 = smov 0  }
   0x2 LB: > { %s33_s16 = sadd.s32 1, %s2597_s14  ;;  %p2126_p0 = scmp.ge.s32.totalorder %s2601_s15, 1  ;;  %s2601_s15 = sphi %s2667_s15, %s21_s15   ;;  %s2597_s14 = sphi %s2665_s14, %s3095_s14   ;;  %s2593_s13 = sphi %s2663_s13, %s3094_s13  }
   0x3   : > { %p35_p1 = scmp.ge.s32.totalorder %s33_s16, 2  ;;  %p375_p2 = scmp.lt.s32.totalorder %s2601_s15, 3 }
   0x5   : > { %s3097_s16 = smov (%p35_p1, %s33_s16), 0  ;;  %p376_p3 = pnand %p2126_p0, %p375_p2 }
   0x6   : > { %p450_p4 = scmp.lt.s32.totalorder (!%p376_p3), %s2593_s13, 1  ;;  %vm567_vm0 = vcmask (!%p376_p3), 261120   ;;  %s2603_s21 = smov (!%p376_p3), 32   ;;  %vm1376_vm1 = vcmask (!%p376_p3), 523264   ;;  %vm1381_vm2 = vcmask (!%p376_p3), 785408  }
   0x7   : > { %379 = sbr.rel (%p376_p3) target bundleno = 1446 (0x5a6), region = 56  ;;  %s2604_s28 = smov (!%p376_p3), 64  }
   0xe   : > { %s3099_s13 = smov (!%p450_p4, %s2593_s13), 1 }
   0xf   : > { %s2684_s17 = sshll.u32 %s3099_s13, 6  ;;  %s2137_s25 = sshll.u32 %s3099_s13, 2 }
  0x10   : > { %s2690_s20 = scalar_lea.vmem %s3085_s2, %s2684_s17  ;;  %s2698_s23 = scalar_lea.vmem %s3084_s1, %s2684_s17 }
  0x11   : > { %v2435_v0 = vld [vmem:[%s2690_s20] sm:$0xff]   ;;  %v2436_v1 = vld [vmem:[%s2690_s20 + $0x30] sm:$0xff]   ;;  %v2437_v3 = vld [vmem:[%s2690_s20 + $0x8] sm:$0xff]   ;;  %s2834_s26 = scalar_lea.vmem %s3086_s3, %s2684_s17 }
  0x12   : > { %2368 = vmatprep.subr.msk.bf16.mxu0 %vm567_vm0, %v2435_v0  ;;  %v575_v2 = vsel %vm567_vm0, %v2435_v0, 0  ;;  %2374 = vmatprep.subr.msk.bf16.mxu1 %vm567_vm0, %v2436_v1  ;;  %v818_v4 = vsel %vm567_vm0, %v2436_v1, 0  ;;  %v2438_v5 = vld [vmem:[%s2690_s20 + $0x38] sm:$0xff]   ;;  %v2439_v6 = vld [vmem:[%s2698_s23] sm:$0xff]   ;;  %v2442_v7 = vld [vmem:[%s2698_s23 + $0x30] sm:$0xff]   ;;  %v578_v8 = vsel %vm567_vm0, %v2437_v3, 0 }
  0x13   : > { %2277 = vmatpush3.bf16.xpose.msra.mxu0 %v575_v2  ;;  %2301 = vmatpush3.bf16.xpose.msra.mxu1 %v818_v4  ;;  %v2441_v9 = vld [vmem:[%s2690_s20 + $0x10] sm:$0xff]   ;;  %v821_v10 = vsel %vm567_vm0, %v2438_v5, 0  ;;  %v2440_v11 = vld [vmem:[%s2698_s23 + $0x8] sm:$0xff]   ;;  %v2443_v12 = vld [vmem:[%s2698_s23 + $0x38] sm:$0xff]  }
  0x14   : > { %2369 = vmatprep.subr.msk.bf16.mxu0 %vm567_vm0, %v2437_v3  ;;  %2375 = vmatprep.subr.msk.bf16.mxu1 %vm567_vm0, %v2438_v5  ;;  %v2444_v13 = vld [vmem:[%s2690_s20 + $0x18] sm:$0xff]   ;;  %v2445_v14 = vld [vmem:[%s2698_s23 + $0x10] sm:$0xff]   ;;  %v656_v15 = vsel %vm567_vm0, %v2441_v9, 0  ;;  %v2447_v16 = vld [vmem:[%s2690_s20 + $0x20] sm:$0xff]  }
  0x15   : > { %2280 = vmatprep.mubr.msk.bf16.mxu0 %vm567_vm0, %v2439_v6  ;;  %2304 = vmatprep.mubr.msk.bf16.mxu1 %vm567_vm0, %v2442_v7  ;;  %v659_v17 = vsel %vm567_vm0, %v2444_v13, 0  ;;  %v2446_v18 = vld [vmem:[%s2698_s23 + $0x18] sm:$0xff]   ;;  %v2449_v19 = vld [vmem:[%s2698_s23 + $0x20] sm:$0xff]   ;;  %v737_v20 = vsel %vm567_vm0, %v2447_v16, 0  ;;  %v2448_v21 = vld [vmem:[%s2690_s20 + $0x28] sm:$0xff]  }
  0x16   : > { %v740_v22 = vsel %vm567_vm0, %v2448_v21, 0  ;;  %v2450_v23 = vld [vmem:[%s2698_s23 + $0x28] sm:$0xff]  }
  0x1b   : > { %2279 = vmatpush3.bf16.xpose.msra.mxu0 %v578_v8  ;;  %2303 = vmatpush3.bf16.xpose.msra.mxu1 %v821_v10 }
  0x1c   : > { %2370 = vmatprep.subr.msk.bf16.mxu0 %vm567_vm0, %v2441_v9 }
  0x22   : > { %2281 = vmatmul.mubr.msk.bf16.vlgmr.msra.gmra.mrb[0].mxu0 %vm567_vm0, %v2440_v11  ;;  %2305 = vmatmul.mubr.msk.bf16.vlgmr.msra.gmra.mrb[0].mxu1 %vm567_vm0, %v2443_v12 }
  0x23   : > { %2285 = vmatpush3.bf16.xpose.msra.mxu0 %v656_v15  ;;  %2288 = vmatprep.mubr.msk.bf16.mxu0 %vm567_vm0, %v2445_v14 }
  0x24   : > { %2371 = vmatprep.subr.msk.bf16.mxu0 %vm567_vm0, %v2444_v13 }
  0x2b   : > { %2287 = vmatpush3.bf16.xpose.msra.mxu0 %v659_v17 }
  0x2c   : > { %2372 = vmatprep.subr.msk.bf16.mxu0 %vm567_vm0, %v2447_v16 }
  0x32   : > { %2289 = vmatmul.mubr.msk.bf16.vlgmr.msra.gmra.mrb[4].mxu0 %vm567_vm0, %v2446_v18 }
  0x33   : > { %2293 = vmatpush3.bf16.xpose.msra.mxu0 %v737_v20  ;;  %2296 = vmatprep.mubr.msk.bf16.mxu0 %vm567_vm0, %v2449_v19 }
  0x34   : > { %2373 = vmatprep.subr.msk.bf16.mxu0 %vm567_vm0, %v2448_v21 }
  0x3b   : > { %2295 = vmatpush3.bf16.xpose.msra.mxu0 %v740_v22 }
  0x42   : > { %2297 = vmatmul.mubr.msk.bf16.vlgmr.msra.gmra.mrb[8].mxu0 %vm567_vm0, %v2450_v23 }
  0xf5   : > { %v2282_v24 = vpop.f32.mrb[0].mxu0  ;;  %v2739_v27 = vpop.f32.mrb[0].mxu1 }
  0xf6   : > { %v614_v25 = vpop.f32.mrb[1].mxu0  ;;  %v878_v26 = vsel %vm567_vm0, %v2282_v24, -inf  ;;  %v857_v30 = vpop.f32.mrb[1].mxu1  ;;  %v914_v54 = vsel %vm567_vm0, %v2739_v27, -inf }
  0xf7   : > { %879 = vmax.xlane.f32.xlu1 %v878_v26  ;;  %v2283_v28 = vpop.f32.mrb[2].mxu0  ;;  %v872_v29 = vsel %vm567_vm0, %v614_v25, -inf  ;;  %v2742_v32 = vpop.f32.mrb[2].mxu1  ;;  %v908_v33 = vsel %vm567_vm0, %v857_v30, -inf }
  0xf8   : > { %873 = vmax.xlane.f32.xlu0 %v872_v29  ;;  %v617_v31 = vpop.f32.mrb[3].mxu0  ;;  %v860_v34 = vpop.f32.mrb[3].mxu1  ;;  %v881_v35 = vsel %vm567_vm0, %v2283_v28, -inf  ;;  %v917_v55 = vsel %vm567_vm0, %v2742_v32, -inf }
  0xf9   : > { %v911_v36 = vsel %vm567_vm0, %v860_v34, -inf  ;;  %v875_v37 = vsel %vm567_vm0, %v617_v31, -inf }
  0xfb   : > { %882 = vmax.xlane.f32.xlu1 %v881_v35 }
  0xfc   : > { %909 = vmax.xlane.f32.xlu0 %v908_v33 }
  0xff   : > { %912 = vmax.xlane.f32.xlu1 %v911_v36 }
 0x100   : > { %876 = vmax.xlane.f32.xlu0 %v875_v37 }
 0x105   : > { %v2290_v38 = vpop.f32.mrb[4].mxu0 }
 0x106   : > { %v2748_v39 = vpop.f32.mrb[5].mxu0  ;;  %v890_v40 = vsel %vm567_vm0, %v2290_v38, -inf }
 0x107   : > { %891 = vmax.xlane.f32.xlu0 %v890_v40  ;;  %v2751_v41 = vpop.f32.mrb[6].mxu0  ;;  %v884_v44 = vsel %vm567_vm0, %v2748_v39, -inf }
 0x108   : > { %v2753_v42 = vpop.f32.mrb[7].mxu0  ;;  %v893_v43 = vsel %vm567_vm0, %v2751_v41, -inf }
 0x109   : > { %894 = vmax.xlane.f32.xlu1 %v893_v43  ;;  %v887_v45 = vsel %vm567_vm0, %v2753_v42, -inf }
 0x10b   : > { %885 = vmax.xlane.f32.xlu0 %v884_v44 }
 0x10d   : > { %888 = vmax.xlane.f32.xlu1 %v887_v45 }
 0x115   : > { %v2761_v46 = vpop.f32.mrb[8].mxu0 }
 0x116   : > { %v2763_v47 = vpop.f32.mrb[9].mxu0  ;;  %v902_v48 = vsel %vm567_vm0, %v2761_v46, -inf }
 0x117   : > { %903 = vmax.xlane.f32.xlu0 %v902_v48  ;;  %v2767_v49 = vpop.f32.mrb[10].mxu0  ;;  %v896_v52 = vsel %vm567_vm0, %v2763_v47, -inf }
 0x118   : > { %v2769_v50 = vpop.f32.mrb[11].mxu0  ;;  %v905_v51 = vsel %vm567_vm0, %v2767_v49, -inf }
 0x119   : > { %906 = vmax.xlane.f32.xlu1 %v905_v51  ;;  %v899_v53 = vsel %vm567_vm0, %v2769_v50, -inf }
 0x11b   : > { %897 = vmax.xlane.f32.xlu0 %v896_v52 }
 0x11d   : > { %900 = vmax.xlane.f32.xlu1 %v899_v53 }
 0x11f   : > { %915 = vmax.xlane.f32.xlu0 %v914_v54 }
 0x121   : > { %918 = vmax.xlane.f32.xlu1 %v917_v55 }
 0x184   : > { %v880_v56 = vpop.xlane.xlu1 %879 }
 0x185   : > { %v922_v57 = vsub.f32 %v2282_v24, %v880_v56  ;;  %v874_v58 = vpop.xlane.xlu0 %873 }
 0x186   : > { %v920_v59 = vsub.f32 %v614_v25, %v874_v58 }
 0x187   : > { %v940_v60 = vmul.f32 1.442695, %v922_v57 }
 0x188   : > { %v936_v61 = vmul.f32 1.442695, %v920_v59  ;;  %v883_v62 = vpop.xlane.xlu1 %882 }
 0x189   : > { %2515 = vpow2.f32 %v940_v60  ;;  %v923_v63 = vsub.f32 %v2283_v28, %v883_v62  ;;  %v910_v0 = vpop.xlane.xlu0 %909 }
 0x18a   : > { %v932_v1 = vsub.f32 %v857_v30, %v910_v0  ;;  %2517 = vpow2.f32 %v936_v61 }
 0x18b   : > { %v942_v2 = vmul.f32 1.442695, %v923_v63  ;;  %v2451_v63 = vld [vmem:[%s2834_s26] sm:$0xff]  }
 0x18c   : > { %v960_v3 = vmul.f32 1.442695, %v932_v1  ;;  %v913_v4 = vpop.xlane.xlu1 %912  ;;  %2308 = vmatprep.subr.bf16.mxu0 %v2451_v63 }
 0x18d   : > { %2519 = vpow2.f32 %v942_v2  ;;  %v933_v5 = vsub.f32 %v860_v34, %v913_v4  ;;  %v877_v6 = vpop.xlane.xlu0 %876  ;;  %2309 = vmatpush3.bf16.msra.mxu0 %v2451_v63  ;;  %v2452_v2 = vld [vmem:[%s2834_s26 + $0x8] sm:$0xff]  }
 0x18e   : > { %v921_v7 = vsub.f32 %v617_v31, %v877_v6  ;;  %2521 = vpow2.f32 %v960_v3  ;;  %2310 = vmatprep.subr.bf16.mxu0 %v2452_v2 }
 0x18f   : > { %v962_v8 = vmul.f32 1.442695, %v933_v5 }
 0x190   : > { %v938_v9 = vmul.f32 1.442695, %v921_v7 }
 0x191   : > { %2311 = vmatpush3.bf16.msra.mxu0 %v2452_v2 }
 0x192   : > { %2523 = vpow2.f32 %v938_v9 }
 0x193   : > { %v2781_v10 = vpop.eup %2515  ;;  %2525 = vpow2.f32 %v962_v8 }
 0x194   : > { %v892_v11 = vpop.xlane.xlu0 %891  ;;  %v974_v12 = vsel %vm567_vm0, %v2781_v10, 0.0  ;;  %v2785_v13 = vpop.eup %2517 }
 0x195   : > { %v926_v14 = vsub.f32 %v2290_v38, %v892_v11  ;;  %975 = vadd.xlane.f32.xlu0 %v974_v12  ;;  %v968_v20 = vsel %vm567_vm0, %v2785_v13, 0.0  ;;  %v2453_v11 = vld [vmem:[%s2834_s26 + $0x10] sm:$0xff]   ;;  %v2454_v12 = vld [vmem:[%s2834_s26 + $0x18] sm:$0xff]  }
 0x196   : > { %v895_v15 = vpop.xlane.xlu1 %894  ;;  %2316 = vmatprep.subr.bf16.mxu1 %v2453_v11 }
 0x197   : > { %v2787_v16 = vpop.eup %2519  ;;  %v948_v17 = vmul.f32 1.442695, %v926_v14  ;;  %v927_v18 = vsub.f32 %v2751_v41, %v895_v15  ;;  %2317 = vmatpush3.bf16.msra.mxu1 %v2453_v11  ;;  %v2455_v14 = vld [vmem:[%s2834_s26 + $0x20] sm:$0xff]   ;;  %v2866_v15 = vld [vmem:[%s2834_s26 + $0x30] sm:$0xff]  }
 0x198   : > { %v886_v19 = vpop.xlane.xlu0 %885  ;;  %v977_v21 = vsel %vm567_vm0, %v2787_v16, 0.0  ;;  %v2794_v22 = vpop.eup %2521  ;;  %2318 = vmatprep.subr.bf16.mxu1 %v2454_v12  ;;  %2324 = vmatprep.subr.bf16.mxu0 %v2455_v14 }
 0x199   : > { %2527 = vpow2.f32 %v948_v17  ;;  %v950_v23 = vmul.f32 1.442695, %v927_v18  ;;  %v924_v24 = vsub.f32 %v2748_v39, %v886_v19  ;;  %969 = vadd.xlane.f32.xlu0 %v968_v20  ;;  %978 = vadd.xlane.f32.xlu1 %v977_v21  ;;  %v1004_v30 = vsel %vm567_vm0, %v2794_v22, 0.0 }
 0x19a   : > { %v889_v25 = vpop.xlane.xlu1 %888 }
 0x19b   : > { %2529 = vpow2.f32 %v950_v23  ;;  %v944_v26 = vmul.f32 1.442695, %v924_v24  ;;  %v925_v28 = vsub.f32 %v2753_v42, %v889_v25  ;;  %2319 = vmatpush3.bf16.msra.mxu1 %v2454_v12 }
 0x19c   : > { %v2798_v29 = vpop.eup %2523  ;;  %2332 = vmatprep.subr.bf16.mxu1 %v2866_v15 }
 0x19d   : > { %2531 = vpow2.f32 %v944_v26  ;;  %v946_v31 = vmul.f32 1.442695, %v925_v28  ;;  %1005 = vadd.xlane.f32.xlu0 %v1004_v30  ;;  %v971_v33 = vsel %vm567_vm0, %v2798_v29, 0.0  ;;  %v2804_v34 = vpop.eup %2525 }
 0x19e   : > { %972 = vadd.xlane.f32.xlu1 %v971_v33  ;;  %v1007_v35 = vsel %vm567_vm0, %v2804_v34, 0.0 }
 0x19f   : > { %2533 = vpow2.f32 %v946_v31 }
 0x1a2   : > { %1008 = vadd.xlane.f32.xlu1 %v1007_v35 }
 0x1a3   : > { %v2808_v36 = vpop.eup %2527 }
 0x1a4   : > { %v904_v37 = vpop.xlane.xlu0 %903  ;;  %v986_v38 = vsel %vm567_vm0, %v2808_v36, 0.0 }
 0x1a5   : > { %v2812_v39 = vpop.eup %2529  ;;  %v930_v40 = vsub.f32 %v2761_v46, %v904_v37  ;;  %987 = vadd.xlane.f32.xlu0 %v986_v38 }
 0x1a6   : > { %v907_v41 = vpop.xlane.xlu1 %906  ;;  %v989_v42 = vsel %vm567_vm0, %v2812_v39, 0.0 }
 0x1a7   : > { %v2817_v43 = vpop.eup %2531  ;;  %v956_v44 = vmul.f32 1.442695, %v930_v40  ;;  %v931_v45 = vsub.f32 %v2767_v49, %v907_v41  ;;  %990 = vadd.xlane.f32.xlu1 %v989_v42 }
 0x1a8   : > { %v898_v48 = vpop.xlane.xlu0 %897  ;;  %v980_v51 = vsel %vm567_vm0, %v2817_v43, 0.0 }
 0x1a9   : > { %v2822_v52 = vpop.eup %2533  ;;  %2535 = vpow2.f32 %v956_v44  ;;  %v958_v53 = vmul.f32 1.442695, %v931_v45  ;;  %v928_v46 = vsub.f32 %v2763_v47, %v898_v48  ;;  %981 = vadd.xlane.f32.xlu0 %v980_v51  ;;  %v2456_v45 = vld [vmem:[%s2834_s26 + $0x28] sm:$0xff]  }
 0x1aa   : > { %v901_v54 = vpop.xlane.xlu1 %900  ;;  %v983_v55 = vsel %vm567_vm0, %v2822_v52, 0.0 }
 0x1ab   : > { %2537 = vpow2.f32 %v958_v53  ;;  %v952_v56 = vmul.f32 1.442695, %v928_v46  ;;  %v929_v49 = vsub.f32 %v2769_v50, %v901_v54  ;;  %984 = vadd.xlane.f32.xlu1 %v983_v55 }
 0x1ac   : > { %v916_v57 = vpop.xlane.xlu0 %915 }
 0x1ad   : > { %2539 = vpow2.f32 %v952_v56  ;;  %v954_v58 = vmul.f32 1.442695, %v929_v49  ;;  %v934_v59 = vsub.f32 %v2739_v27, %v916_v57 }
 0x1ae   : > { %v919_v60 = vpop.xlane.xlu1 %918 }
 0x1af   : > { %2541 = vpow2.f32 %v954_v58  ;;  %v964_v61 = vmul.f32 1.442695, %v934_v59  ;;  %v935_v47 = vsub.f32 %v2742_v32, %v919_v60 }
 0x1b1   : > { %2543 = vpow2.f32 %v964_v61  ;;  %v966_v62 = vmul.f32 1.442695, %v935_v47  ;;  %v2458_v47 = vld [vmem:[%s2834_s26 + $0x38] sm:$0xff]   ;;  %s2225_s26 = sshll.u32 %s3099_s13, 5 }
 0x1b2   : > { %s457_s17 = scalar_lea.vmem %s3083_s0, %s2225_s26  ;;  %s3062_s24 = scalar_lea.vmem %s3092_s9, %s2225_s26 }
 0x1b3   : > { %v2836_v50 = vpop.eup %2535  ;;  %2545 = vpow2.f32 %v966_v62 }
 0x1b4   : > { %v998_v27 = vsel %vm567_vm0, %v2836_v50, 0.0 }
 0x1b5   : > { %v2841_v0 = vpop.eup %2537  ;;  %999 = vadd.xlane.f32.xlu0 %v998_v27 }
 0x1b6   : > { %v1001_v32 = vsel %vm567_vm0, %v2841_v0, 0.0 }
 0x1b7   : > { %v2845_v1 = vpop.eup %2539  ;;  %1002 = vadd.xlane.f32.xlu1 %v1001_v32 }
 0x1b8   : > { %v992_v3 = vsel %vm567_vm0, %v2845_v1, 0.0 }
 0x1b9   : > { %v2850_v4 = vpop.eup %2541  ;;  %993 = vadd.xlane.f32.xlu0 %v992_v3 }
 0x1ba   : > { %v995_v5 = vsel %vm567_vm0, %v2850_v4, 0.0 }
 0x1bb   : > { %v2854_v6 = vpop.eup %2543  ;;  %996 = vadd.xlane.f32.xlu1 %v995_v5 }
 0x1bc   : > { %v1010_v7 = vsel %vm567_vm0, %v2854_v6, 0.0 }
 0x1bd   : > { %v2858_v8 = vpop.eup %2545  ;;  %1011 = vadd.xlane.f32.xlu0 %v1010_v7 }
 0x1be   : > { %v1013_v9 = vsel %vm567_vm0, %v2858_v8, 0.0 }
 0x1bf   : > { %1014 = vadd.xlane.f32.xlu1 %v1013_v9 }
 0x222   : > { %v976_v17 = vpop.xlane.xlu0 %975 }
 0x226   : > { %v979_v18 = vpop.xlane.xlu1 %978  ;;  %v970_v19 = vpop.xlane.xlu0 %969 }
 0x227   : > { %2547 = vrcp.f32 %v979_v18  ;;  %v2462_v18 = vld [vmem:[%s3087_s4 + $0x18] sm:$0xff]  }
 0x228   : > { %2549 = vrcp.f32 %v970_v19 }
 0x229   : > { %2551 = vrcp.f32 %v976_v17  ;;  %v2461_v17 = vld [vmem:[%s3087_s4 + $0x10] sm:$0xff]  }
 0x22a   : > { %v1006_v21 = vpop.xlane.xlu0 %1005 }
 0x22b   : > { %v973_v20 = vpop.xlane.xlu1 %972 }
 0x22c   : > { %2553 = vrcp.f32 %v973_v20  ;;  %v2463_v20 = vld [vmem:[%s3087_s4 + $0x20] sm:$0xff]  }
 0x22d   : > { %2555 = vrcp.f32 %v1006_v21 }
 0x22f   : > { %v1009_v23 = vpop.xlane.xlu1 %1008 }
 0x230   : > { %2557 = vrcp.f32 %v1009_v23 }
 0x231   : > { %v2548_v25 = vpop.eup %2547 }
 0x232   : > { %v988_v24 = vpop.xlane.xlu0 %987  ;;  %v2550_v26 = vpop.eup %2549  ;;  %v1035_v33 = vmul.f32 %v2548_v25, %v2787_v16 }
 0x233   : > { %v2552_v30 = vpop.eup %2551  ;;  %v1032_v37 = vmul.f32 %v2550_v26, %v2785_v13 }
 0x234   : > { %v991_v28 = vpop.xlane.xlu1 %990  ;;  %v1034_v40 = vmul.f32 %v2552_v30, %v2781_v10  ;;  %v2465_v30 = vld [vmem:[%s3087_s4 + $0x30] sm:$0xff]  }
 0x235   : > { %2559 = vrcp.f32 %v991_v28  ;;  %v2464_v28 = vld [vmem:[%s3087_s4 + $0x28] sm:$0xff]  }
 0x236   : > { %v2554_v31 = vpop.eup %2553  ;;  %v982_v35 = vpop.xlane.xlu0 %981  ;;  %v1049_v44 = vpack.c.bf16 %v1035_v33, %v1034_v40  ;;  %v2466_v33 = vld [vmem:[%s3087_s4 + $0x38] sm:$0xff]  }
 0x237   : > { %2561 = vrcp.f32 %v982_v35  ;;  %v1033_v38 = vmul.f32 %v2554_v31, %v2798_v29  ;;  %v2556_v16 = vpop.eup %2555 }
 0x238   : > { %2563 = vrcp.f32 %v988_v24  ;;  %v985_v41 = vpop.xlane.xlu1 %984  ;;  %v1044_v60 = vmul.f32 %v2556_v16, %v2794_v22  ;;  %v2467_v16 = vld [vmem:[%s3090_s7] ss:$8 sps:$4 sm:$0xff]  }
 0x239   : > { %2565 = vrcp.f32 %v985_v41  ;;  %v1048_v42 = vpack.c.bf16 %v1033_v38, %v1032_v37 }
 0x23a   : > { %v2558_v48 = vpop.eup %2557 }
 0x23b   : > { %2312 = vmatprep.mubr.msk.bf16.mxu0 %vm567_vm0, %v1048_v42  ;;  %v1045_v49 = vmul.f32 %v2558_v48, %v2804_v34  ;;  %v2469_v48 = vld [vmem:[%s3090_s7 + $0x4] ss:$8 sps:$4 sm:$0xff]  }
 0x23c   : > { %2313 = vmatmul.mubr.msk.bf16.vlgmr.msra.gmra.mrb[12].mxu0 %vm567_vm0, %v1049_v44 }
 0x23d   : > { %2325 = vmatpush3.bf16.msra.mxu0 %v2455_v14  ;;  %v1054_v62 = vpack.c.bf16 %v1045_v49, %v1044_v60  ;;  %v2481_v49 = vld [vmem:[%s3090_s7 + $0x44] ss:$8 sps:$4 sm:$0xff]  }
 0x23e   : > { %2326 = vmatprep.subr.bf16.mxu0 %v2456_v45  ;;  %v2487_v60 = vld [vmem:[%s3090_s7 + $0x64] ss:$8 sps:$4 sm:$0xff]  }
 0x23f   : > { %v2560_v51 = vpop.eup %2559 }
 0x240   : > { %v1039_v46 = vmul.f32 %v2560_v51, %v2812_v39 }
 0x241   : > { %v2562_v13 = vpop.eup %2561  ;;  %2327 = vmatpush3.bf16.msra.mxu0 %v2456_v45 }
 0x242   : > { %v2564_v29 = vpop.eup %2563  ;;  %v1000_v10 = vpop.xlane.xlu0 %999  ;;  %v1036_v55 = vmul.f32 %v2562_v13, %v2817_v43 }
 0x243   : > { %v2566_v53 = vpop.eup %2565  ;;  %v1038_v57 = vmul.f32 %v2564_v29, %v2808_v36  ;;  %v2472_v29 = vld [vmem:[%s3090_s7 + $0x14] ss:$8 sps:$4 sm:$0xff]  }
 0x244   : > { %v1003_v54 = vpop.xlane.xlu1 %1002  ;;  %v1037_v56 = vmul.f32 %v2566_v53, %v2822_v52  ;;  %v2470_v53 = vld [vmem:[%s3090_s7 + $0x10] ss:$8 sps:$4 sm:$0xff]  }
 0x245   : > { %2567 = vrcp.f32 %v1003_v54  ;;  %v1051_v61 = vpack.c.bf16 %v1039_v46, %v1038_v57  ;;  %v2475_v46 = vld [vmem:[%s3090_s7 + $0x24] ss:$8 sps:$4 sm:$0xff]   ;;  %v2473_v54 = vld [vmem:[%s3090_s7 + $0x20] ss:$8 sps:$4 sm:$0xff]  }
 0x246   : > { %v994_v58 = vpop.xlane.xlu0 %993  ;;  %v1050_v59 = vpack.c.bf16 %v1037_v56, %v1036_v55  ;;  %v2478_v55 = vld [vmem:[%s3090_s7 + $0x34] ss:$8 sps:$4 sm:$0xff]   ;;  %v2476_v56 = vld [vmem:[%s3090_s7 + $0x30] ss:$8 sps:$4 sm:$0xff]   ;;  %v2479_v57 = vld [vmem:[%s3090_s7 + $0x40] ss:$8 sps:$4 sm:$0xff]  }
 0x247   : > { %2569 = vrcp.f32 %v994_v58  ;;  %v2484_v58 = vld [vmem:[%s3090_s7 + $0x54] ss:$8 sps:$4 sm:$0xff]  }
 0x248   : > { %2571 = vrcp.f32 %v1000_v10  ;;  %2320 = vmatprep.mubr.msk.bf16.mxu1 %vm567_vm0, %v1050_v59  ;;  %v997_v39 = vpop.xlane.xlu1 %996  ;;  %v2482_v59 = vld [vmem:[%s3090_s7 + $0x50] ss:$8 sps:$4 sm:$0xff]  }
 0x249   : > { %2573 = vrcp.f32 %v997_v39  ;;  %2321 = vmatmul.mubr.msk.bf16.vlgmr.msra.gmra.mrb[4].mxu1 %vm567_vm0, %v1051_v61  ;;  %v2485_v61 = vld [vmem:[%s3090_s7 + $0x60] ss:$8 sps:$4 sm:$0xff]  }
 0x24a   : > { %v1012_v43 = vpop.xlane.xlu0 %1011  ;;  %2336 = vmatprep.mubr.msk.bf16.mxu1 %vm567_vm0, %v1054_v62  ;;  %2333 = vmatpush3.bf16.msra.mxu1 %v2866_v15 }
 0x24b   : > { %2575 = vrcp.f32 %v1012_v43  ;;  %2334 = vmatprep.subr.bf16.mxu1 %v2458_v47 }
 0x24c   : > { %v1015_v34 = vpop.xlane.xlu1 %1014 }
 0x24d   : > { %2577 = vrcp.f32 %v1015_v34 }
 0x24e   : > { %2335 = vmatpush3.bf16.msra.mxu1 %v2458_v47 }
 0x24f   : > { %v2568_v22 = vpop.eup %2567  ;;  %1628 = vmatprep.subr.bf16.mxu1 %v2469_v48  ;;  %v2496_v48 = vld [vmem:[%s3089_s6 + $0x14] ss:$8 sps:$4 sm:$0xff]  }
 0x250   : > { %v1043_v27 = vmul.f32 %v2568_v22, %v2841_v0  ;;  %v2459_v0 = vld [vmem:[%s3087_s4] sm:$0xff]  }
 0x251   : > { %v2570_v36 = vpop.eup %2569  ;;  %2340 = vmatprep.subr.bf16.mxu0 %v2459_v0 }
 0x252   : > { %v2572_v52 = vpop.eup %2571  ;;  %v1040_v32 = vmul.f32 %v2570_v36, %v2845_v1 }
 0x253   : > { %v2574_v63 = vpop.eup %2573  ;;  %v1042_v5 = vmul.f32 %v2572_v52, %v2836_v50 }
 0x254   : > { %v1041_v2 = vmul.f32 %v2574_v63, %v2850_v4 }
 0x255   : > { %v2576_v3 = vpop.eup %2575  ;;  %v1053_v11 = vpack.c.bf16 %v1043_v27, %v1042_v5 }
 0x256   : > { %v1052_v7 = vpack.c.bf16 %v1041_v2, %v1040_v32  ;;  %v1046_v12 = vmul.f32 %v2576_v3, %v2854_v6 }
 0x257   : > { %v2578_v9 = vpop.eup %2577 }
 0x258   : > { %v1047_v14 = vmul.f32 %v2578_v9, %v2858_v8  ;;  %2328 = vmatprep.mubr.msk.bf16.mxu0 %vm567_vm0, %v1052_v7  ;;  %v2460_v8 = vld [vmem:[%s3087_s4 + $0x8] sm:$0xff]  }
 0x259   : > { %2329 = vmatmul.mubr.msk.bf16.vlgmr.msra.gmra.mrb[16].mxu0 %vm567_vm0, %v1053_v11 }
 0x25a   : > { %v1055_v15 = vpack.c.bf16 %v1047_v14, %v1046_v12  ;;  %2341 = vmatpush3.bf16.msra.mxu0 %v2459_v0 }
 0x25b   : > { %2342 = vmatprep.subr.bf16.mxu0 %v2460_v8 }
 0x25c   : > { %2337 = vmatmul.mubr.msk.bf16.vlgmr.msra.gmra.mrb[8].mxu1 %vm567_vm0, %v1055_v15 }
 0x25d   : > { %1629 = vmatpush1.bf16.msra.mxu1 %v2467_v16 }
 0x25e   : > { %2343 = vmatpush3.bf16.msra.mxu0 %v2460_v8  ;;  %1630 = vmatprep.subr.bf16.mxu1 %v2472_v29  ;;  %v2497_v29 = vld [vmem:[%s3089_s6 + $0x20] ss:$8 sps:$4 sm:$0xff]  }
 0x25f   : > { %2344 = vmatprep.subr.bf16.mxu0 %v2461_v17 }
 0x261   : > { %1631 = vmatpush1.bf16.msra.mxu1 %v2470_v53  ;;  %v2500_v53 = vld [vmem:[%s3089_s6 + $0x30] ss:$8 sps:$4 sm:$0xff]  }
 0x262   : > { %2345 = vmatpush3.bf16.msra.mxu0 %v2461_v17  ;;  %1632 = vmatprep.subr.bf16.mxu1 %v2475_v46  ;;  %v2505_v46 = vld [vmem:[%s3089_s6 + $0x44] ss:$8 sps:$4 sm:$0xff]  }
 0x263   : > { %2346 = vmatprep.subr.bf16.mxu0 %v2462_v18 }
 0x265   : > { %1633 = vmatpush1.bf16.msra.mxu1 %v2473_v54  ;;  %v2503_v54 = vld [vmem:[%s3089_s6 + $0x40] ss:$8 sps:$4 sm:$0xff]  }
 0x266   : > { %2347 = vmatpush3.bf16.msra.mxu0 %v2462_v18  ;;  %1634 = vmatprep.subr.bf16.mxu1 %v2478_v55  ;;  %v2508_v55 = vld [vmem:[%s3089_s6 + $0x54] ss:$8 sps:$4 sm:$0xff]  }
 0x267   : > { %2348 = vmatprep.subr.bf16.mxu0 %v2463_v20 }
 0x269   : > { %1635 = vmatpush1.bf16.msra.mxu1 %v2476_v56  ;;  %v2506_v56 = vld [vmem:[%s3089_s6 + $0x50] ss:$8 sps:$4 sm:$0xff]  }
 0x26a   : > { %2349 = vmatpush3.bf16.msra.mxu0 %v2463_v20  ;;  %1636 = vmatprep.subr.bf16.mxu1 %v2481_v49  ;;  %v2511_v49 = vld [vmem:[%s3089_s6 + $0x64] ss:$8 sps:$4 sm:$0xff]  }
 0x26b   : > { %2350 = vmatprep.subr.bf16.mxu0 %v2464_v28 }
 0x26d   : > { %1637 = vmatpush1.bf16.msra.mxu1 %v2479_v57  ;;  %v2509_v57 = vld [vmem:[%s3089_s6 + $0x60] ss:$8 sps:$4 sm:$0xff]  }
 0x26e   : > { %2351 = vmatpush3.bf16.msra.mxu0 %v2464_v28  ;;  %1638 = vmatprep.subr.bf16.mxu1 %v2484_v58  ;;  %v2606_v28 = vmov 0   ;;  %v2514_v58 = vld [vmem:[%s3089_s6 + $0x74] ss:$8 sps:$4 sm:$0xff]  }
 0x26f   : > { %2352 = vmatprep.subr.bf16.mxu0 %v2465_v30  ;;  %1660 = vmatprep.mubr.bf16.mxu1 %v2606_v28 }
 0x271   : > { %1639 = vmatpush1.bf16.msra.mxu1 %v2482_v59  ;;  %v2512_v59 = vld [vmem:[%s3089_s6 + $0x70] ss:$8 sps:$4 sm:$0xff]  }
 0x272   : > { %2353 = vmatpush3.bf16.msra.mxu0 %v2465_v30  ;;  %1640 = vmatprep.subr.bf16.mxu1 %v2487_v60  ;;  %v1508_v60 = vld [vmem:[%s457_s17] sm:$0xff] }
 0x273   : > { %2354 = vmatprep.subr.bf16.mxu0 %v2466_v33 }
 0x275   : > { %1641 = vmatpush1.bf16.msra.mxu1 %v2485_v61  ;;  %v1509_v61 = vld [vmem:[%s457_s17 + $0x8] sm:$0xff] }
 0x276   : > { %2355 = vmatpush3.bf16.msra.mxu0 %v2466_v33 }
 0x30f   : > { %v2899_v50 = vpop.f32.mrb[12].mxu0 }
 0x310   : > { %v2901_v1 = vpop.f32.mrb[13].mxu0 }
 0x311   : > { %v2903_v4 = vpop.f32.mrb[14].mxu0 }
 0x312   : > { %v2905_v6 = vpop.f32.mrb[15].mxu0 }
 0x31c   : > { %v2322_v19 = vpop.f32.mrb[4].mxu1 }
 0x31d   : > { %v1175_v21 = vpop.f32.mrb[5].mxu1 }
 0x31e   : > { %v2323_v23 = vpop.f32.mrb[6].mxu1 }
 0x31f   : > { %v2405_v24 = vpack.i.bf16 %v2323_v23, %v2322_v19  ;;  %v1178_v25 = vpop.f32.mrb[7].mxu1 }
 0x320   : > { %v2410_v26 = vpack.i.bf16 %v1178_v25, %v1175_v21  ;;  %v2490_v25 = vld [vmem:[%s3090_s7 + $0x74] ss:$8 sps:$4 sm:$0xff]  }
 0x321   : > { %2406 = vrot.lane.b32.xlu1 %v2405_v24, %s2603_s21  ;;  %1642 = vmatprep.subr.bf16.mxu1 %v2490_v25 }
 0x322   : > { %2411 = vrot.lane.b32.xlu0 %v2410_v26, %s2603_s21  ;;  %s2605_s21 = smov 96   ;;  %v2493_v26 = vld [vmem:[%s3089_s6 + $0x4] ss:$8 sps:$4 sm:$0xff]  }
 0x32c   : > { %v2330_v31 = vpop.f32.mrb[16].mxu0 }
 0x32d   : > { %v1242_v35 = vpop.f32.mrb[17].mxu0 }
 0x32e   : > { %v2331_v37 = vpop.f32.mrb[18].mxu0 }
 0x32f   : > { %v2415_v38 = vpack.i.bf16 %v2331_v37, %v2330_v31  ;;  %v1245_v40 = vpop.f32.mrb[19].mxu0  ;;  %v2338_v41 = vpop.f32.mrb[8].mxu1  ;;  %v2178_v31 = vld [vmem:[%s3088_s5] ss:$0 sm:$0xff] }
 0x330   : > { %v2420_v42 = vpack.i.bf16 %v1245_v40, %v1242_v35  ;;  %v1309_v44 = vpop.f32.mrb[9].mxu1 }
 0x331   : > { %2416 = vrot.lane.b32.xlu1 %v2415_v38, %s2604_s28  ;;  %v2339_v45 = vpop.f32.mrb[10].mxu1 }
 0x332   : > { %v2430_v51 = vpack.i.bf16 %v2339_v45, %v2338_v41  ;;  %v1312_v13 = vpop.f32.mrb[11].mxu1  ;;  %v2491_v45 = vld [vmem:[%s3089_s6] ss:$8 sps:$4 sm:$0xff]  }
 0x333   : > { %v2425_v10 = vpack.i.bf16 %v1312_v13, %v1309_v44  ;;  %v2499_v13 = vld [vmem:[%s3089_s6 + $0x24] ss:$8 sps:$4 sm:$0xff]  }
 0x335   : > { %2421 = vrot.lane.b32.xlu1 %v2420_v42, %s2604_s28  ;;  %2426 = vrot.lane.b32.xlu0 %v2425_v10, %s2605_s21  ;;  %v2502_v10 = vld [vmem:[%s3089_s6 + $0x34] ss:$8 sps:$4 sm:$0xff]   ;;  %s497_s28 = scalar_lea.vmem %s3093_s10, %s2137_s25 }
 0x339   : > { %2431 = vrot.lane.b32.xlu1 %v2430_v51, %s2605_s21  ;;  %v2494_v51 = vld [vmem:[%s3089_s6 + $0x10] ss:$8 sps:$4 sm:$0xff]  }
 0x393   : > { %v2407_v47 = vpop.permute.xlu1 %2406 }
 0x394   : > { %v2412_v39 = vpop.permute.xlu0 %2411  ;;  %v2409_v22 = vunpack.i.h.bf16 %v2407_v47  ;;  %v2408_v36 = vunpack.i.l.bf16 %v2407_v47  ;;  %v1512_v47 = vpack.c.bf16 %v1509_v61, %v1508_v60 }
 0x395   : > { %v2414_v43 = vunpack.i.h.bf16 %v2412_v39  ;;  %v2413_v34 = vunpack.i.l.bf16 %v2412_v39  ;;  %v1510_v39 = vld [vmem:[%s457_s17 + $0x10] sm:$0xff] }
 0x396   : > { %v1375_v15 = vsel %vm567_vm0, %v2903_v4, %v2409_v22 }
 0x397   : > { %v1373_v5 = vsel %vm567_vm0, %v2905_v6, %v2414_v43  ;;  %v1372_v7 = vsel %vm567_vm0, %v2901_v1, %v2413_v34  ;;  %v1374_v6 = vsel %vm567_vm0, %v2899_v50, %v2408_v36  ;;  %v2488_v50 = vld [vmem:[%s3090_s7 + $0x70] ss:$8 sps:$4 sm:$0xff]   ;;  %v1816_v34 = vlaneseq }
 0x398   : > { %1643 = vmatpush1.bf16.msra.mxu1 %v2488_v50 }
 0x399   : > { %1761 = vmatprep.subr.bf16.mxu1 %v2493_v26  ;;  %v3050_v22 = vshrl.u32 %v1816_v34, 7  ;;  %vm1937_vm3 = vcmp.lt.s32.totalorder %v1816_v34, 512 }
 0x39b   : > { %v1818_v36 = vsub.s32 0, %v3050_v22 }
 0x3a3   : > { %v2417_v62 = vpop.permute.xlu1 %2416 }
 0x3a4   : > { %v2419_v9 = vunpack.i.h.bf16 %v2417_v62  ;;  %v2418_v11 = vunpack.i.l.bf16 %v2417_v62  ;;  %v1511_v62 = vld [vmem:[%s457_s17 + $0x18] sm:$0xff] }
 0x3a5   : > { %v1513_v43 = vpack.c.bf16 %v1511_v62, %v1510_v39 }
 0x3a6   : > { %v1379_v20 = vsel %vm1376_vm1, %v1374_v6, %v2418_v11  ;;  %v1380_v21 = vsel %vm1376_vm1, %v1375_v15, %v2419_v9 }
 0x3a7   : > { %v2427_v52 = vpop.permute.xlu0 %2426  ;;  %v2422_v63 = vpop.permute.xlu1 %2421 }
 0x3a8   : > { %v2429_v27 = vunpack.i.h.bf16 %v2427_v52  ;;  %v2428_v32 = vunpack.i.l.bf16 %v2427_v52  ;;  %v2424_v2 = vunpack.i.h.bf16 %v2422_v63  ;;  %v2423_v3 = vunpack.i.l.bf16 %v2422_v63  ;;  %v1814_v52 = vld [vmem:[%s3091_s8] sm:$0x3] }
 0x3a9   : > { %v1822_v63 = vsub.s32 1, %v3050_v22 }
 0x3aa   : > { %v1378_v12 = vsel %vm1376_vm1, %v1373_v5, %v2424_v2  ;;  %v1377_v14 = vsel %vm1376_vm1, %v1372_v7, %v2423_v3 }
 0x3ab   : > { %v2432_v0 = vpop.permute.xlu1 %2431  ;;  %v1382_v8 = vsel %vm1381_vm2, %v1377_v14, %v2428_v32  ;;  %v1383_v17 = vsel %vm1381_vm2, %v1378_v12, %v2429_v27  ;;  %v1819_v27 = vrot.slane %v1814_v52, %v1818_v36  ;;  %v1823_v32 = vrot.slane %v1814_v52, %v1822_v63 }
 0x3ac   : > { %v2434_v18 = vunpack.i.h.bf16 %v2432_v0  ;;  %v2433_v19 = vunpack.i.l.bf16 %v2432_v0  ;;  %v1386_v1 = vpack.c.bf16 %v1383_v17, %v1382_v8 }
 0x3ae   : > { %v1384_v23 = vsel %vm1381_vm2, %v1379_v20, %v2433_v19  ;;  %v1385_v24 = vsel %vm1381_vm2, %v1380_v21, %v2434_v18  ;;  %2356 = vmatprep.mubr.bf16.mxu0 %v1386_v1 }
 0x3af   : > { %v1387_v4 = vpack.c.bf16 %v1385_v24, %v1384_v23 }
 0x3b1   : > { %2357 = vmatmul.mubr.bf16.vlgmr.msra.gmra.mrb[20].mxu0 %v1387_v4 }
 0x484   : > { %v2358_v30 = vpop.f32.mrb[20].mxu0 }
 0x485   : > { %v1493_v33 = vpop.f32.mrb[21].mxu0  ;;  %v1502_v37 = vadd.f32 %v2358_v30, %v2178_v31 }
 0x486   : > { %v2359_v35 = vpop.f32.mrb[22].mxu0  ;;  %v1494_v41 = vadd.f32 %v2178_v31, %v1493_v33 }
 0x487   : > { %v1505_v38 = vadd.f32 %v2359_v35, %v2178_v31  ;;  %v1496_v40 = vpop.f32.mrb[23].mxu0 }
 0x488   : > { %v1497_v42 = vadd.f32 %v2178_v31, %v1496_v40 }
 0x489   : > { %v1531_v44 = vpack.c.bf16 %v1505_v38, %v1502_v37 }
 0x48a   : > { %v1530_v16 = vpack.c.bf16 %v1497_v42, %v1494_v41 }
 0x48c   : > { %1661 = vmatmul.mubr.bf16.vlgmr.msra.gmra.mrb[12].mxu1 %v1530_v16 }
 0x48d   : > { %1762 = vmatpush1.bf16.msra.mxu1 %v2491_v45  ;;  %1670 = vmatprep.mubr.bf16.mxu1 %v2606_v28 }
 0x48e   : > { %1763 = vmatprep.subr.bf16.mxu1 %v2496_v48 }
 0x491   : > { %1764 = vmatpush1.bf16.msra.mxu1 %v2494_v51 }
 0x492   : > { %1765 = vmatprep.subr.bf16.mxu1 %v2499_v13 }
 0x494   : > { %1671 = vmatmul.mubr.bf16.gmra.mrb[16].mxu1 %v1531_v44 }
 0x495   : > { %1766 = vmatpush1.bf16.msra.mxu1 %v2497_v29  ;;  %1793 = vmatprep.mubr.bf16.mxu1 %v2606_v28 }
 0x496   : > { %1767 = vmatprep.subr.bf16.mxu1 %v2502_v10 }
 0x499   : > { %1768 = vmatpush1.bf16.msra.mxu1 %v2500_v53 }
 0x49a   : > { %1769 = vmatprep.subr.bf16.mxu1 %v2505_v46 }
 0x49d   : > { %1770 = vmatpush1.bf16.msra.mxu1 %v2503_v54 }
 0x49e   : > { %1771 = vmatprep.subr.bf16.mxu1 %v2508_v55 }
 0x4a1   : > { %1772 = vmatpush1.bf16.msra.mxu1 %v2506_v56 }
 0x4a2   : > { %1773 = vmatprep.subr.bf16.mxu1 %v2511_v49 }
 0x4a5   : > { %1774 = vmatpush1.bf16.msra.mxu1 %v2509_v57 }
 0x4a6   : > { %1775 = vmatprep.subr.bf16.mxu1 %v2514_v58 }
 0x4a9   : > { %1776 = vmatpush1.bf16.msra.mxu1 %v2512_v59  ;;  %v2607_v59 = vmov 1966171168  }
 0x4aa   : > { %v1913_v60 = vunpack.c.l.s4 %v2607_v59 }
 0x4ac   : > { %1794 = vmatmul.mubr.bf16.vlgmr.msra.gmra.mrb[12].mxu1 %v1512_v47 }
 0x4ad   : > { %1803 = vmatprep.mubr.bf16.mxu1 %v2606_v28 }
 0x4b4   : > { %1804 = vmatmul.mubr.bf16.gmra.mrb[16].mxu1 %v1513_v43 }
 0x57f   : > { %v1795_v2 = vpop.f32.mrb[12].mxu1 }
 0x580   : > { %v1826_v3 = vadd.f32 %v1819_v27, %v1795_v2  ;;  %v1797_v5 = vpop.f32.mrb[13].mxu1 }
 0x581   : > { %v1827_v7 = vadd.f32 %v1823_v32, %v1797_v5  ;;  %v1799_v9 = vpop.f32.mrb[14].mxu1 }
 0x582   : > { %v1828_v11 = vadd.f32 %v1819_v27, %v1799_v9  ;;  %v1801_v12 = vpop.f32.mrb[15].mxu1  ;;  %v1880_v0 = vmul.f32 %v1826_v3, %v1826_v3 }
 0x583   : > { %v2230_v14 = vpack.c.bf16 %v1827_v7, %v1826_v3  ;;  %v1829_v15 = vadd.f32 %v1823_v32, %v1801_v12  ;;  %v1881_v6 = vmul.f32 %v1827_v7, %v1827_v7 }
 0x584   : > { %v1862_v8 = vadd.f32 %v1828_v11, %v1826_v3  ;;  %v1882_v17 = vmul.f32 %v1828_v11, %v1828_v11 }
 0x585   : > { %1858 = vst [vmem:[%s3062_s24] sm:$0xff] %v2230_v14  ;;  %v2231_v18 = vpack.c.bf16 %v1829_v15, %v1828_v11  ;;  %v1871_v19 = vadd.f32 %v1829_v15, %v1827_v7  ;;  %v1883_v1 = vmul.f32 %v1829_v15, %v1829_v15 }
 0x586   : > { %v1888_v20 = vadd.f32 %v1882_v17, %v1880_v0 }
 0x587   : > { %1859 = vst [vmem:[%s3062_s24 + $0x8] sm:$0xff] %v2231_v18  ;;  %v1897_v21 = vadd.f32 %v1883_v1, %v1881_v6  ;;  %v1805_v23 = vpop.f32.mrb[16].mxu1 }
 0x588   : > { %v1830_v24 = vadd.f32 %v1819_v27, %v1805_v23  ;;  %v1807_v4 = vpop.f32.mrb[17].mxu1 }
 0x589   : > { %v1831_v25 = vadd.f32 %v1823_v32, %v1807_v4  ;;  %v1809_v50 = vpop.f32.mrb[18].mxu1 }
 0x58a   : > { %v1863_v26 = vadd.f32 %v1862_v8, %v1830_v24  ;;  %v1884_v28 = vmul.f32 %v1830_v24, %v1830_v24  ;;  %v1832_v30 = vadd.f32 %v1819_v27, %v1809_v50  ;;  %v1811_v31 = vpop.f32.mrb[19].mxu1  ;;  %v1914_v27 = vunpack.c.0.s8 %v1913_v60 }
 0x58b   : > { %v2232_v33 = vpack.c.bf16 %v1831_v25, %v1830_v24  ;;  %v1872_v35 = vadd.f32 %v1871_v19, %v1831_v25  ;;  %v1885_v37 = vmul.f32 %v1831_v25, %v1831_v25  ;;  %v1833_v38 = vadd.f32 %v1823_v32, %v1811_v31 }
 0x58c   : > { %v1889_v40 = vadd.f32 %v1888_v20, %v1884_v28  ;;  %v1864_v41 = vadd.f32 %v1863_v26, %v1832_v30  ;;  %v1886_v42 = vmul.f32 %v1832_v30, %v1832_v30  ;;  %v1917_v12 = vsub.s32 %v1914_v27, %v3050_v22 }
 0x58d   : > { %1860 = vst [vmem:[%s3062_s24 + $0x10] sm:$0xff] %v2232_v33  ;;  %v1898_v44 = vadd.f32 %v1897_v21, %v1885_v37  ;;  %v2233_v45 = vpack.c.bf16 %v1833_v38, %v1832_v30  ;;  %v1873_v16 = vadd.f32 %v1872_v35, %v1833_v38  ;;  %v1887_v48 = vmul.f32 %v1833_v38, %v1833_v38 }
 0x58e   : > { %v1865_v51 = vrot.slane %v1864_v41, 4  ;;  %v1890_v13 = vadd.f32 %v1889_v40, %v1886_v42 }
 0x58f   : > { %1861 = vst [vmem:[%s3062_s24 + $0x18] sm:$0xff] %v2233_v45  ;;  %v1874_v29 = vrot.slane %v1873_v16, 4  ;;  %v1899_v10 = vadd.f32 %v1898_v44, %v1887_v48 }
 0x590   : > { %v1866_v53 = vadd.f32 %v1865_v51, %v1864_v41  ;;  %v1891_v46 = vrot.slane %v1890_v13, 4 }
 0x591   : > { %v1875_v54 = vadd.f32 %v1874_v29, %v1873_v16  ;;  %v1900_v55 = vrot.slane %v1899_v10, 4 }
 0x592   : > { %v1867_v56 = vrot.slane %v1866_v53, 2  ;;  %v1892_v49 = vadd.f32 %v1891_v46, %v1890_v13 }
 0x593   : > { %v1876_v57 = vrot.slane %v1875_v54, 2  ;;  %v1901_v58 = vadd.f32 %v1900_v55, %v1899_v10 }
 0x594   : > { %v1868_v61 = vadd.f32 %v1867_v56, %v1866_v53  ;;  %v1893_v47 = vrot.slane %v1892_v49, 2 }
 0x595   : > { %v1877_v39 = vadd.f32 %v1876_v57, %v1875_v54  ;;  %v1902_v62 = vrot.slane %v1901_v58, 2 }
 0x596   : > { %v1869_v43 = vrot.slane %v1868_v61, 1  ;;  %v1894_v36 = vadd.f32 %v1893_v47, %v1892_v49 }
 0x597   : > { %v1878_v52 = vrot.slane %v1877_v39, 1  ;;  %v1903_v63 = vadd.f32 %v1902_v62, %v1901_v58 }
 0x598   : > { %v1870_v32 = vadd.f32 %v1869_v43, %v1868_v61  ;;  %v1895_v2 = vrot.slane %v1894_v36, 1 }
 0x599   : > { %v1879_v3 = vadd.f32 %v1878_v52, %v1877_v39  ;;  %v1904_v5 = vrot.slane %v1903_v63, 1 }
 0x59a   : > { %v1896_v7 = vadd.f32 %v1895_v2, %v1894_v36 }
 0x59b   : > { %v1905_v9 = vadd.f32 %v1904_v5, %v1903_v63  ;;  %v1910_v11 = vcombine.low %v1870_v32, %v1879_v3 }
 0x59d   : > { %v1911_v14 = vcombine.low %v1896_v7, %v1905_v9  ;;  %v1918_v15 = vrot.slane %v1910_v11, %v1917_v12 }
 0x59f   : > { %v1925_v0 = vrot.slane %v1911_v14, %v1917_v12 }
 0x5a1   : > { %v1926_v8 = vcombine.low %v1918_v15, %v1925_v0 }
 0x5a3   : > { %v1933_v17 = vrot.slane %v1926_v8, %v1917_v12 }
 0x5a5   : > { %1939 = vst.msk [vmem:[%s497_s28] sm:$0xf] %vm1937_vm3, %v1933_v17 }
 0x5a6 PF: > { %s21_s15 = sadd.s32 1, %s2601_s15   ;;  %s3094_s13 = smov %s2597_s14 }
 0x5a7   : > { %p18_p5 = scmp.ge.s32.totalorder %s21_s15, 4   ;;  %s3095_s14 = smov %s3097_s16 }
 0x5a9   :  { %20 = sbr.rel (!%p18_p5) target bundleno = 2 (0x2), region = 107 }

</bundles_post_ra>
